<compile_context>
chip_gen: v7x
topology: tpu7x:2x2x1
jax: 0.10.0
libtpu: 0.0.40
codegen_flags: <defaults>
</compile_context>

<pallas_src>
import functools

import jax
import jax.numpy as jnp
from jax.experimental import pallas as pl
from jax.experimental.pallas import tpu as pltpu
import numpy as np


# ----------------------------------------------------------------------------
# Pallas kernel: attention for WB window-batch elements, all heads at once.
# ----------------------------------------------------------------------------
def _window_attn_kernel(*refs, WB, N, C, H, hd, bs, has_mask, compute_dtype):
    if has_mask:
        (x_ref, wqkv_ref, bqkv_ref, rpb_ref, mask_ref,
         wproj_ref, bproj_ref, o_ref) = refs
    else:
        (x_ref, wqkv_ref, bqkv_ref, rpb_ref,
         wproj_ref, bproj_ref, o_ref) = refs
        mask_ref = None
    cdt = compute_dtype

    # Fused qkv projection over all WB windows: (WB*N, C) @ (C, 3C) on the MXU.
    # Inputs are already in the compute dtype (cast once in the wrapper);
    # accumulation is f32.
    x2 = x_ref[...].reshape(WB * N, C)
    qkv = jnp.dot(x2, wqkv_ref[...], preferred_element_type=jnp.float32)
    qkv = qkv + bqkv_ref[...]                                           # (WB*N, 3C) f32

    # q / k / v are contiguous C-wide column slices (lane-aligned when C % 128
    # == 0 in real Swin); one transpose each -> (WB*H, N, hd) batched layout.
    def heads(col0):
        t = qkv[:, col0:col0 + C].astype(cdt).reshape(WB, N, H, hd)
        return jnp.transpose(t, (0, 2, 1, 3)).reshape(WB * H, N, hd)

    q3 = heads(0)            # 1/sqrt(head_dim) pre-folded into the q weights
    k3 = heads(C)
    v3 = heads(2 * C)

    # Scores for all (window, head) pairs in one batched contraction (f32 acc).
    s = jnp.einsum('bqd,bkd->bqk', q3, k3,
                   preferred_element_type=jnp.float32)                  # (WB*H, N, N)

    # Relative-position bias: window j within this block uses rpb[j % bs]
    # (matches the torch module's .repeat semantics); broadcast in-kernel
    # instead of materializing a (H, WB, N, N) tile in HBM/VMEM.
    s = s.reshape(WB // bs, bs, H, N, N) + rpb_ref[...][None]
    s = s.reshape(WB, H, N, N)
    if has_mask:
        s = s + mask_ref[...].astype(jnp.float32)[:, None, :, :]
    s = s.reshape(WB * H, N, N)

    # Numerically-stable softmax, kept in f32 (v5e has no bf16 VPU/EUP);
    # the approx reciprocal runs on the EUP slot.
    s = s - jnp.max(s, axis=-1, keepdims=True)
    e = jnp.exp(s)
    p = e * pl.reciprocal(jnp.sum(e, axis=-1, keepdims=True), approx=True)

    o = jnp.einsum('bqk,bkd->bqd', p.astype(cdt), v3,
                   preferred_element_type=jnp.float32)                  # (WB*H, N, hd)
    # Back to token-major layout with a single transpose (no per-head concat).
    y = jnp.transpose(o.reshape(WB, H, N, hd), (0, 2, 1, 3)).reshape(WB * N, C)

    out = jnp.dot(y.astype(cdt), wproj_ref[...],
                  preferred_element_type=jnp.float32) + bproj_ref[...]
    o_ref[...] = out.reshape(WB, N, C).astype(o_ref.dtype)


# ----------------------------------------------------------------------------
# Block-size selection (generation-aware VMEM budget).
# ----------------------------------------------------------------------------
def _default_vmem_budget():
    """~70% of per-core VMEM (v5e/v6e: 128 MiB, v7x: 64 MiB), capped at 96 MiB."""
    try:
        cap = int(pltpu.get_tpu_info().vmem_capacity_bytes)
    except Exception:
        cap = 64 << 20          # conservative fallback (v7x per-core VMEM)
    return min(int(cap * 0.7), 96 << 20)


def _vmem_estimate(wb, N, C, H, bs, itemsize):
    """Rough VMEM footprint for one grid step with WB=wb windows.
    Resident (constant index_map) blocks are counted once; streamed blocks are
    double-buffered; f32 compute intermediates are counted explicitly."""
    f32 = 4
    resident = ((C * 3 * C + C * C) * itemsize          # w_qkv, w_proj
                + (3 * C + C) * f32                      # biases
                + bs * H * N * N * f32)                  # rel-pos bias
    streamed = 2 * (wb * N * C * itemsize                # x, double-buffered
                    + wb * N * N * itemsize              # mask, double-buffered
                    + wb * N * C * f32)                  # out, double-buffered
    compute = (wb * N * 3 * C * f32                      # fused qkv accumulator
               + 3 * wb * N * C * itemsize               # q3 / k3 / v3
               + 3 * wb * H * N * N * f32                # scores / exp / probs
               + 2 * wb * N * C * f32)                   # o / projected out
    return resident + streamed + compute


def _choose_windows_per_block(B_, bs, N, C, H, *, itemsize, target_rows=512,
                              vmem_budget_bytes=None):
    """Pick WB = bs * k with k | (B_ // bs); grow until ~target_rows MXU rows
    or the VMEM budget is reached, keeping >=2 grid steps so the 'parallel'
    axis can shard across v7x's two TensorCores (harmless on v5e/v6e).
    If even the smallest candidate exceeds the budget it is still returned and
    we rely on the compiler's scoped-VMEM handling."""
    if vmem_budget_bytes is None:
        vmem_budget_bytes = _default_vmem_budget()
    n_groups = B_ // bs
    candidates = [bs * k for k in range(1, n_groups + 1) if n_groups % k == 0]
    best = candidates[0]
    for wb in candidates[1:]:
        if best * N >= target_rows:
            break
        if B_ // wb < 2:                       # keep the grid shardable (v7x)
            break
        if _vmem_estimate(wb, N, C, H, bs, itemsize) > vmem_budget_bytes:
            break
        best = wb
    return best


# ----------------------------------------------------------------------------
# Wrapper.
# ----------------------------------------------------------------------------
def window_attention_pallas(x, w_qkv, b_qkv, w_proj, b_proj, rpb_g, mask_g,
                            *, num_heads, windows_per_block=None,
                            compute_dtype=jnp.bfloat16):
    """x: (B_, N, C).
    rpb_g:  (bs, H, N, N) gathered relative-position bias; window-batch element
            g uses rpb_g[g % bs] (matches the torch module's .repeat semantics).
    mask_g: (B_, N, N) gathered additive attention mask (head-deduplicated),
            or None for the non-shifted (mask-free) variant.
    compute_dtype: MXU input dtype (bf16 by default); accumulation and all
            softmax element-wise math are always f32."""
    B_, N, C = x.shape
    H = num_heads
    hd = C // H
    assert hd * H == C
    scale = hd ** -0.5
    bs = rpb_g.shape[0]
    assert B_ % bs == 0

    cdt = jnp.dtype(compute_dtype)
    out_dtype = x.dtype
    has_mask = mask_g is not None

    # Fold 1/sqrt(head_dim) into the q columns of the qkv projection, then cast
    # the MXU operands to the compute dtype once, here (no per-step casts).
    w_qkv_s = jnp.asarray(w_qkv, jnp.float32).at[:, :C].multiply(scale).astype(cdt)
    b_qkv_s = jnp.asarray(b_qkv, jnp.float32).at[:C].multiply(scale)
    x_c = x.astype(cdt)
    w_proj_c = jnp.asarray(w_proj, cdt)
    rpb_f = jnp.asarray(rpb_g, jnp.float32)     # resident; added in f32
    mask_c = mask_g.astype(cdt) if has_mask else None   # streamed per step

    itemsize = cdt.itemsize
    vmem_budget = _default_vmem_budget()
    if windows_per_block is None:
        WB = _choose_windows_per_block(B_, bs, N, C, H, itemsize=itemsize,
                                       vmem_budget_bytes=vmem_budget)
    else:
        WB = windows_per_block
    assert B_ % WB == 0 and WB % bs == 0, (B_, WB, bs)

    kernel = functools.partial(_window_attn_kernel, WB=WB, N=N, C=C, H=H,
                               hd=hd, bs=bs, has_mask=has_mask,
                               compute_dtype=cdt)

    flops = B_ * (2 * N * C * 3 * C          # qkv projection
                  + 4 * H * N * N * hd       # q@k^T + p@v
                  + 2 * N * C * C)           # output projection
    bytes_accessed = (B_ * N * C * (itemsize + jnp.dtype(out_dtype).itemsize)
                      + (B_ * N * N * itemsize if has_mask else 0)
                      + bs * H * N * N * 4
                      + (C * 3 * C + C * C) * itemsize + 4 * C * 4)
    cost = pl.CostEstimate(flops=int(flops), transcendentals=int(B_ * H * N * N),
                           bytes_accessed=int(bytes_accessed))

    in_specs = [
        pl.BlockSpec((WB, N, C), lambda g: (g, 0, 0)),          # x (streamed)
        pl.BlockSpec((C, 3 * C), lambda g: (0, 0)),             # w_qkv (resident, q pre-scaled)
        pl.BlockSpec((1, 3 * C), lambda g: (0, 0)),             # b_qkv (resident)
        pl.BlockSpec((bs, H, N, N), lambda g: (0, 0, 0, 0)),    # rel-pos bias (resident)
    ]
    args = [x_c, w_qkv_s, b_qkv_s.reshape(1, -1), rpb_f]
    if has_mask:
        in_specs.append(pl.BlockSpec((WB, N, N), lambda g: (g, 0, 0)))  # mask (streamed)
        args.append(mask_c)
    in_specs += [
        pl.BlockSpec((C, C), lambda g: (0, 0)),                 # w_proj (resident)
        pl.BlockSpec((1, C), lambda g: (0, 0)),                 # b_proj (resident)
    ]
    args += [w_proj_c, jnp.asarray(b_proj, jnp.float32).reshape(1, -1)]

    return pl.pallas_call(
        kernel,
        out_shape=jax.ShapeDtypeStruct((B_, N, C), out_dtype),
        grid_spec=pltpu.PrefetchScalarGridSpec(
            num_scalar_prefetch=0,
            grid=(B_ // WB,),
            in_specs=in_specs,
            out_specs=pl.BlockSpec((WB, N, C), lambda g: (g, 0, 0)),
        ),
        compiler_params=pltpu.CompilerParams(
            dimension_semantics=("parallel",),
            vmem_limit_bytes=int(vmem_budget)),
        cost_estimate=cost,
    )(*args)


# ----------------------------------------------------------------------------
# Glue: relative position index + masked gathers (pure indexing, plain JAX).
# These mirror the torch module's repeat/gather chain exactly:
#   rel-pos bias / ids_keep use index g % batch_size, the mask uses g % nW.
# ----------------------------------------------------------------------------
def make_relative_position_index(window_size):
    Wh, Ww = window_size
    coords = np.stack(np.meshgrid(np.arange(Wh), np.arange(Ww), indexing="ij"))
    coords_flat = coords.reshape(2, -1)                               # (2, Wh*Ww)
    rel = coords_flat[:, :, None] - coords_flat[:, None, :]           # (2, S, S)
    rel = rel.transpose(1, 2, 0).copy()
    rel[:, :, 0] += Wh - 1
    rel[:, :, 1] += Ww - 1
    rel[:, :, 0] *= 2 * Ww - 1
    return jnp.asarray(rel.sum(-1), dtype=jnp.int32)                  # (S, S)


def gather_relative_position_bias(rpb_table, rpi, ids_keep):
    """(bs, H, N, N): rel-pos bias at kept-token pairs, one per batch element."""
    rpi_m = rpi[ids_keep[:, :, None], ids_keep[:, None, :]]           # (bs, N, N)
    rpb = rpb_table[rpi_m]                                            # (bs, N, N, H)
    return jnp.transpose(rpb, (0, 3, 1, 2))                           # (bs, H, N, N)


def gather_attention_mask(mask, ids_keep, B_):
    """(B_, N, N): additive mask for global window-batch index g:
    mask[g % nW] gathered with ids_keep[g % bs] (torch repeat/gather semantics)."""
    nW = mask.shape[0]
    bs = ids_keep.shape[0]
    g = jnp.arange(B_)
    mask_rep = mask[g % nW]                                           # (B_, S, S)
    ids_rep = ids_keep[g % bs]                                        # (B_, N)
    return mask_rep[g[:, None, None], ids_rep[:, :, None], ids_rep[:, None, :]]


# ----------------------------------------------------------------------------
# Pure-JAX reference (mirrors the PyTorch forward) for verification.
# ----------------------------------------------------------------------------
def reference(x, w_qkv, b_qkv, w_proj, b_proj, bias_mask, num_heads):
    B_, N, C = x.shape
    H = num_heads
    hd = C // H
    scale = hd ** (-0.5)
    qkv = x @ w_qkv + b_qkv                                           # (B_, N, 3C)
    qkv = qkv.reshape(B_, N, 3, H, hd).transpose(2, 0, 3, 1, 4)
    q, k, v = qkv[0] * scale, qkv[1], qkv[2]
    attn = jnp.einsum("bhnd,bhmd->bhnm", q, k) + bias_mask
    attn = jax.nn.softmax(attn, axis=-1)
    out = jnp.einsum("bhnm,bhmd->bhnd", attn, v)
    out = out.transpose(0, 2, 1, 3).reshape(B_, N, C)
    return out @ w_proj + b_proj


# ----------------------------------------------------------------------------
if __name__ == "__main__":
    # Small, module-consistent shapes.
    dim = 32
    num_heads = 4
    window_size = (4, 4)
    S = window_size[0] * window_size[1]     # tokens per window = 16
    N = 8                                   # kept tokens per window
    batch_size = 2
    nW = 2                                  # number of windows
    B_ = nW * batch_size                    # 4

    key = jax.random.PRNGKey(0)
    keys = jax.random.split(key, 8)

    # Deterministic parameter init (synthetic; not a checkpoint load).
    rpb_table = 0.02 * jax.random.normal(
        keys[0], ((2 * window_size[0] - 1) * (2 * window_size[1] - 1), num_heads),
        dtype=jnp.float32)
    w_qkv = 0.05 * jax.random.normal(keys[1], (dim, 3 * dim), dtype=jnp.float32)
    b_qkv = 0.01 * jax.random.normal(keys[2], (3 * dim,), dtype=jnp.float32)
    w_proj = 0.05 * jax.random.normal(keys[3], (dim, dim), dtype=jnp.float32)
    b_proj = 0.01 * jax.random.normal(keys[4], (dim,), dtype=jnp.float32)

    # Inputs.
    x = jax.random.normal(keys[5], (B_, N, dim), dtype=jnp.float32)
    ids_keep = jnp.stack([
        jax.random.permutation(jax.random.fold_in(keys[6], b), S)[:N]
        for b in range(batch_size)
    ]).astype(jnp.int32)                                              # (bs, N)
    mask_bits = jax.random.bernoulli(keys[7], 0.3, (nW, S, S))
    mask = jnp.where(mask_bits, -100.0, 0.0).astype(jnp.float32)      # (nW, S, S)

    # Glue: deduplicated bias / mask gathers.
    rpi = make_relative_position_index(window_size)
    rpb_g = gather_relative_position_bias(rpb_table, rpi, ids_keep)   # (bs, H, N, N)
    mask_g = gather_attention_mask(mask, ids_keep, B_)                # (B_, N, N)

    # Full additive bias for the reference (what the torch module adds to attn).
    rpb_full = rpb_g[jnp.arange(B_) % batch_size]                     # (B_, H, N, N)
    bias_full = rpb_full + mask_g[:, None, :, :]
    ref = reference(x, w_qkv, b_qkv, w_proj, b_proj, bias_full, num_heads)
    ref_nomask = reference(x, w_qkv, b_qkv, w_proj, b_proj, rpb_full, num_heads)

    # 1) Default path: bf16 MXU inputs, auto-chosen WB (grid kept >= 2 steps).
    out = window_attention_pallas(x, w_qkv, b_qkv, w_proj, b_proj, rpb_g, mask_g,
                                  num_heads=num_heads)
    out = jax.block_until_ready(out)
    np.testing.assert_allclose(np.asarray(out), np.asarray(ref),
                               rtol=2e-2, atol=2e-2)

    # 2) f32 compute path, all windows per step (WB > bs broadcast path, grid=(1,)).
    out2 = window_attention_pallas(x, w_qkv, b_qkv, w_proj, b_proj, rpb_g, mask_g,
                                   num_heads=num_heads, windows_per_block=4,
                                   compute_dtype=jnp.float32)
    out2 = jax.block_until_ready(out2)
    # Tolerance loosened vs f32-exact because of pl.reciprocal(approx=True).
    np.testing.assert_allclose(np.asarray(out2), np.asarray(ref),
                               rtol=3e-3, atol=3e-3)

    # 3) Mask-free variant (non-shifted Swin block): no mask stream, no mask add.
    out3 = window_attention_pallas(x, w_qkv, b_qkv, w_proj, b_proj, rpb_g, None,
                                   num_heads=num_heads,
                                   compute_dtype=jnp.float32)
    out3 = jax.block_until_ready(out3)
    np.testing.assert_allclose(np.asarray(out3), np.asarray(ref_nomask),
                               rtol=3e-3, atol=3e-3)

    print("KERNEL_OK")
</pallas_src>

<mosaic_0001>
module attributes {stable_mosaic.version = 11 : i64} {
  func.func @_window_attn_kernel(%arg0: i32, %arg1: memref<2x8x32xbf16, #tpu.memory_space<vmem>>, %arg2: memref<32x96xbf16, #tpu.memory_space<vmem>>, %arg3: memref<1x96xf32, #tpu.memory_space<vmem>>, %arg4: memref<2x4x8x8xf32, #tpu.memory_space<vmem>>, %arg5: memref<2x8x8xbf16, #tpu.memory_space<vmem>>, %arg6: memref<32x32xbf16, #tpu.memory_space<vmem>>, %arg7: memref<1x32xf32, #tpu.memory_space<vmem>>, %arg8: memref<2x8x32xf32, #tpu.memory_space<vmem>>) attributes {dimension_semantics = [#tpu.dimension_semantics<parallel>], iteration_bounds = array<i64: 2>, scalar_prefetch = 0 : i64, scratch_operands = 0 : i64, tpu.core_type = #tpu.core_type<tc>, window_params = [{transform_indices = @transform_0, window_bounds = array<i64: 2, 8, 32>}, {pipeline_mode = #tpu.pipeline_mode<synchronous>, transform_indices = @transform_1, window_bounds = array<i64: 32, 96>}, {pipeline_mode = #tpu.pipeline_mode<synchronous>, transform_indices = @transform_2, window_bounds = array<i64: 1, 96>}, {pipeline_mode = #tpu.pipeline_mode<synchronous>, transform_indices = @transform_3, window_bounds = array<i64: 2, 4, 8, 8>}, {transform_indices = @transform_4, window_bounds = array<i64: 2, 8, 8>}, {pipeline_mode = #tpu.pipeline_mode<synchronous>, transform_indices = @transform_5, window_bounds = array<i64: 32, 32>}, {pipeline_mode = #tpu.pipeline_mode<synchronous>, transform_indices = @transform_6, window_bounds = array<i64: 1, 32>}, {transform_indices = @transform_7, window_bounds = array<i64: 2, 8, 32>}]} {
    %c0 = arith.constant 0 : index
    %c0_0 = arith.constant 0 : index
    %c0_1 = arith.constant 0 : index
    %0 = vector.load %arg1[%c0, %c0_0, %c0_1] : memref<2x8x32xbf16, #tpu.memory_space<vmem>>, vector<2x8x32xbf16>
    %1 = vector.shape_cast %0 : vector<2x8x32xbf16> to vector<16x32xbf16>
    %c0_2 = arith.constant 0 : index
    %c0_3 = arith.constant 0 : index
    %2 = vector.load %arg2[%c0_2, %c0_3] : memref<32x96xbf16, #tpu.memory_space<vmem>>, vector<32x96xbf16>
    %cst = arith.constant dense<0.000000e+00> : vector<16x96xf32>
    %3 = tpu.matmul %1, %2, %cst {dimension_numbers = #tpu.dot_dimension_numbers<[1], [0], [0], [1], [0, 0, 1, 1], [], []>} : vector<16x32xbf16>, vector<32x96xbf16>, vector<16x96xf32> -> vector<16x96xf32>
    %c0_4 = arith.constant 0 : index
    %c0_5 = arith.constant 0 : index
    %4 = vector.load %arg3[%c0_4, %c0_5] : memref<1x96xf32, #tpu.memory_space<vmem>>, vector<1x96xf32>
    %5 = vector.broadcast %4 : vector<1x96xf32> to vector<16x96xf32>
    %6 = arith.addf %3, %5 : vector<16x96xf32>
    %7 = vector.extract_strided_slice %6 {offsets = [0, 0], sizes = [16, 32], strides = [1, 1]} : vector<16x96xf32> to vector<16x32xf32>
    %8 = arith.truncf %7 : vector<16x32xf32> to vector<16x32xbf16>
    %9 = vector.shape_cast %8 : vector<16x32xbf16> to vector<2x8x4x8xbf16>
    %10 = tpu.transpose %9, [0, 2, 1, 3] : vector<2x8x4x8xbf16> -> vector<2x4x8x8xbf16>
    %11 = vector.shape_cast %10 : vector<2x4x8x8xbf16> to vector<8x8x8xbf16>
    %12 = vector.extract_strided_slice %6 {offsets = [0, 32], sizes = [16, 32], strides = [1, 1]} : vector<16x96xf32> to vector<16x32xf32>
    %13 = arith.truncf %12 : vector<16x32xf32> to vector<16x32xbf16>
    %14 = vector.shape_cast %13 : vector<16x32xbf16> to vector<2x8x4x8xbf16>
    %15 = tpu.transpose %14, [0, 2, 1, 3] : vector<2x8x4x8xbf16> -> vector<2x4x8x8xbf16>
    %16 = vector.shape_cast %15 : vector<2x4x8x8xbf16> to vector<8x8x8xbf16>
    %17 = vector.extract_strided_slice %6 {offsets = [0, 64], sizes = [16, 32], strides = [1, 1]} : vector<16x96xf32> to vector<16x32xf32>
    %18 = arith.truncf %17 : vector<16x32xf32> to vector<16x32xbf16>
    %19 = vector.shape_cast %18 : vector<16x32xbf16> to vector<2x8x4x8xbf16>
    %20 = tpu.transpose %19, [0, 2, 1, 3] : vector<2x8x4x8xbf16> -> vector<2x4x8x8xbf16>
    %21 = vector.shape_cast %20 : vector<2x4x8x8xbf16> to vector<8x8x8xbf16>
    "tpu.trace_start"() <{level = 10 : i32, message = "bqd,bkd->bqk"}> : () -> ()
    %cst_6 = arith.constant dense<0.000000e+00> : vector<8x8x8xf32>
    %22 = tpu.matmul %11, %16, %cst_6 {dimension_numbers = #tpu.dot_dimension_numbers<[2], [2], [1], [1], [0, 0, 0, 1, 1, 1], [0], [0]>} : vector<8x8x8xbf16>, vector<8x8x8xbf16>, vector<8x8x8xf32> -> vector<8x8x8xf32>
    "tpu.trace_stop"() : () -> ()
    %23 = vector.shape_cast %22 : vector<8x8x8xf32> to vector<1x2x4x8x8xf32>
    %c0_7 = arith.constant 0 : index
    %c0_8 = arith.constant 0 : index
    %c0_9 = arith.constant 0 : index
    %c0_10 = arith.constant 0 : index
    %24 = vector.load %arg4[%c0_7, %c0_8, %c0_9, %c0_10] : memref<2x4x8x8xf32, #tpu.memory_space<vmem>>, vector<2x4x8x8xf32>
    %25 = vector.shape_cast %24 : vector<2x4x8x8xf32> to vector<1x2x4x8x8xf32>
    %26 = arith.addf %23, %25 : vector<1x2x4x8x8xf32>
    %27 = vector.shape_cast %26 : vector<1x2x4x8x8xf32> to vector<2x4x8x8xf32>
    %c0_11 = arith.constant 0 : index
    %c0_12 = arith.constant 0 : index
    %c0_13 = arith.constant 0 : index
    %28 = vector.load %arg5[%c0_11, %c0_12, %c0_13] : memref<2x8x8xbf16, #tpu.memory_space<vmem>>, vector<2x8x8xbf16>
    %29 = arith.extf %28 : vector<2x8x8xbf16> to vector<2x8x8xf32>
    %30 = vector.shape_cast %29 : vector<2x8x8xf32> to vector<2x1x8x8xf32>
    %31 = vector.broadcast %30 : vector<2x1x8x8xf32> to vector<2x4x8x8xf32>
    %32 = arith.addf %27, %31 : vector<2x4x8x8xf32>
    %33 = vector.shape_cast %32 : vector<2x4x8x8xf32> to vector<8x8x8xf32>
    %cst_14 = arith.constant dense<0xFF800000> : vector<8x8xf32>
    %34 = vector.multi_reduction <maximumf>, %33, %cst_14 [2] : vector<8x8x8xf32> to vector<8x8xf32>
    %35 = vector.shape_cast %34 : vector<8x8xf32> to vector<8x8x1xf32>
    %36 = vector.broadcast %35 : vector<8x8x1xf32> to vector<8x8x8xf32>
    %37 = arith.subf %33, %36 : vector<8x8x8xf32>
    %38 = math.exp %37 : vector<8x8x8xf32>
    %cst_15 = arith.constant dense<0.000000e+00> : vector<8x8xf32>
    %39 = vector.multi_reduction <add>, %38, %cst_15 [2] : vector<8x8x8xf32> to vector<8x8xf32>
    %40 = vector.shape_cast %39 : vector<8x8xf32> to vector<8x8x1xf32>
    %41 = tpu.reciprocal %40 {approx = true} : vector<8x8x1xf32> -> vector<8x8x1xf32>
    %42 = vector.broadcast %41 : vector<8x8x1xf32> to vector<8x8x8xf32>
    %43 = arith.mulf %38, %42 : vector<8x8x8xf32>
    %44 = arith.truncf %43 : vector<8x8x8xf32> to vector<8x8x8xbf16>
    "tpu.trace_start"() <{level = 10 : i32, message = "bqk,bkd->bqd"}> : () -> ()
    %cst_16 = arith.constant dense<0.000000e+00> : vector<8x8x8xf32>
    %45 = tpu.matmul %44, %21, %cst_16 {dimension_numbers = #tpu.dot_dimension_numbers<[2], [1], [1], [2], [0, 0, 0, 1, 1, 2], [0], [0]>} : vector<8x8x8xbf16>, vector<8x8x8xbf16>, vector<8x8x8xf32> -> vector<8x8x8xf32>
    "tpu.trace_stop"() : () -> ()
    %46 = vector.shape_cast %45 : vector<8x8x8xf32> to vector<2x4x8x8xf32>
    %47 = tpu.transpose %46, [0, 2, 1, 3] : vector<2x4x8x8xf32> -> vector<2x8x4x8xf32>
    %48 = vector.shape_cast %47 : vector<2x8x4x8xf32> to vector<16x32xf32>
    %49 = arith.truncf %48 : vector<16x32xf32> to vector<16x32xbf16>
    %c0_17 = arith.constant 0 : index
    %c0_18 = arith.constant 0 : index
    %50 = vector.load %arg6[%c0_17, %c0_18] : memref<32x32xbf16, #tpu.memory_space<vmem>>, vector<32x32xbf16>
    %cst_19 = arith.constant dense<0.000000e+00> : vector<16x32xf32>
    %51 = tpu.matmul %49, %50, %cst_19 {dimension_numbers = #tpu.dot_dimension_numbers<[1], [0], [0], [1], [0, 0, 1, 1], [], []>} : vector<16x32xbf16>, vector<32x32xbf16>, vector<16x32xf32> -> vector<16x32xf32>
    %c0_20 = arith.constant 0 : index
    %c0_21 = arith.constant 0 : index
    %52 = vector.load %arg7[%c0_20, %c0_21] : memref<1x32xf32, #tpu.memory_space<vmem>>, vector<1x32xf32>
    %53 = vector.broadcast %52 : vector<1x32xf32> to vector<16x32xf32>
    %54 = arith.addf %51, %53 : vector<16x32xf32>
    %55 = vector.shape_cast %54 : vector<16x32xf32> to vector<2x8x32xf32>
    %c0_22 = arith.constant 0 : index
    %c0_23 = arith.constant 0 : index
    %c0_24 = arith.constant 0 : index
    %56 = vector.load %arg8[%c0_22, %c0_23, %c0_24] : memref<2x8x32xf32, #tpu.memory_space<vmem>>, vector<2x8x32xf32>
    tpu.vector_store %arg8[%c0_22, %c0_23, %c0_24], %55 {strides = array<i32>} : memref<2x8x32xf32, #tpu.memory_space<vmem>>, vector<2x8x32xf32>,
    return
  }
  func.func @transform_0(%arg0: i32) -> (i32, i32, i32) {
    %c0_i32 = arith.constant 0 : i32
    %c0_i32_0 = arith.constant 0 : i32
    %c0_i32_1 = arith.constant 0 : i32
    return %arg0, %c0_i32, %c0_i32_0 : i32, i32, i32
  }
  func.func @transform_1(%arg0: i32) -> (i32, i32) {
    %c0_i32 = arith.constant 0 : i32
    %c0_i32_0 = arith.constant 0 : i32
    %c0_i32_1 = arith.constant 0 : i32
    return %c0_i32, %c0_i32_0 : i32, i32
  }
  func.func @transform_2(%arg0: i32) -> (i32, i32) {
    %c0_i32 = arith.constant 0 : i32
    %c0_i32_0 = arith.constant 0 : i32
    %c0_i32_1 = arith.constant 0 : i32
    return %c0_i32, %c0_i32_0 : i32, i32
  }
  func.func @transform_3(%arg0: i32) -> (i32, i32, i32, i32) {
    %c0_i32 = arith.constant 0 : i32
    %c0_i32_0 = arith.constant 0 : i32
    %c0_i32_1 = arith.constant 0 : i32
    %c0_i32_2 = arith.constant 0 : i32
    %c0_i32_3 = arith.constant 0 : i32
    return %c0_i32, %c0_i32_0, %c0_i32_1, %c0_i32_2 : i32, i32, i32, i32
  }
  func.func @transform_4(%arg0: i32) -> (i32, i32, i32) {
    %c0_i32 = arith.constant 0 : i32
    %c0_i32_0 = arith.constant 0 : i32
    %c0_i32_1 = arith.constant 0 : i32
    return %arg0, %c0_i32, %c0_i32_0 : i32, i32, i32
  }
  func.func @transform_5(%arg0: i32) -> (i32, i32) {
    %c0_i32 = arith.constant 0 : i32
    %c0_i32_0 = arith.constant 0 : i32
    %c0_i32_1 = arith.constant 0 : i32
    return %c0_i32, %c0_i32_0 : i32, i32
  }
  func.func @transform_6(%arg0: i32) -> (i32, i32) {
    %c0_i32 = arith.constant 0 : i32
    %c0_i32_0 = arith.constant 0 : i32
    %c0_i32_1 = arith.constant 0 : i32
    return %c0_i32, %c0_i32_0 : i32, i32
  }
  func.func @transform_7(%arg0: i32) -> (i32, i32, i32) {
    %c0_i32 = arith.constant 0 : i32
    %c0_i32_0 = arith.constant 0 : i32
    %c0_i32_1 = arith.constant 0 : i32
    return %arg0, %c0_i32, %c0_i32_0 : i32, i32, i32
  }
}

</mosaic_0001>

<bundles_post_ra>
// kernel: tpu_custom_call.1
= control target key start
LH: loop header
LB: loop body
LE: loop exit
PB: predicated region body
PF: predicated region fallthrough
CT: control target
= control target key end

     0   :  { %s3948_s0 = inlined_call_operand.hbm [shape: bf16[4,8,32], index: 0, kind: input, shape index: {}]   ;;  %s3949_s1 = inlined_call_operand.hbm [shape: bf16[32,96], index: 1, kind: input, shape index: {}]   ;;  %s3950_s2 = inlined_call_operand.vmem [shape: f32[1,96], index: 2, kind: input, shape index: {}]   ;;  %s3951_s3 = inlined_call_operand.hbm [shape: f32[2,4,8,8], index: 3, kind: input, shape index: {}]   ;;  %s3952_s4 = inlined_call_operand.hbm [shape: bf16[4,8,8], index: 4, kind: input, shape index: {}]   ;;  %s3953_s5 = inlined_call_operand.vmem [shape: bf16[32,32], index: 5, kind: input, shape index: {}]   ;;  %s3954_s6 = inlined_call_operand.vmem [shape: f32[1,32], index: 6, kind: input, shape index: {}]   ;;  %s3955_s7 = inlined_call_operand.hbm [shape: f32[4,8,32], index: 7, kind: output, shape index: {}]  }
   0x1   :  { %3967 = sst [smem:[#allocation18_spill]] %s3948_s0 }
   0x2   :  { %3968 = sst [smem:[#allocation19_spill]] %s3949_s1 }
   0x3   :  { %3969 = sst [smem:[#allocation20_spill]] %s3951_s3 }
   0x4   :  { %12 = vsyncpa [#allocation3], 0 }
   0x5   :  { %14 = vsyncpa [#allocation3 + $0x1], 0 }
   0x6   :  { %15 = vsyncpa [#allocation6], 0 }
   0x7   :  { %16 = vsyncpa [#allocation9], 0 }
   0x8   :  { %18 = vsyncpa [#allocation9 + $0x1], 0 }
   0x9   :  { %19 = vsyncpa [#allocation4], 0 }
   0xa   :  { %21 = vsyncpa [#allocation4 + $0x1], 0  ;;  %s3273_s24 = smov 0   ;;  %s3275_s25 = smov 0  }
   0xb   :  { %s3277_s26 = smov 0   ;;  %s3279_s27 = smov 0  }
   0xc LB: > { %3970 = sst [smem:[#allocation15_spill]] %s3204_s26  ;;  %s3294_s28 = sadd.s32 4294967295, %s3208_s27   ;;  %s3208_s27 = sphi %s3279_s27, %s3992_s27   ;;  %s3204_s26 = sphi %s3277_s26, %s3994_s26   ;;  %s3200_s25 = sphi %s3275_s25, %s3996_s25   ;;  %s3196_s24 = sphi %s3273_s24, %s3995_s24  }
   0xd   : > { %s2656_s29 = sadd.s32 4294967294, %s3208_s27   ;;  %p47_p0 = scmp.ne.s32.totalorder %s3200_s25, %s3196_s24 }
   0xe   : > { %p3956_p1 = scmp.eq.s32.totalorder %s3294_s28, 0  ;;  %p208_p3 = scmp.eq.s32.totalorder %s2656_s29, 1 }
   0xf   : > { %p2657_p5 = scmp.ge.s32.totalorder %s3208_s27, 1  ;;  %p215_p7 = scmp.lt.s32.totalorder %s3208_s27, 3 }
  0x10   : > { %p3303_p4 = por %p3956_p1, %p47_p0  ;;  %p3308_p6 = por %p208_p3, %p47_p0 }
  0x11   : > { %p3313_p8 = pnand %p2657_p5, %p215_p7  ;;  %s3210_s10 = smov [#allocation5]  }
  0x12   : > { %s3971_s30 = scalar_select %p3303_p4, 1, 0 }
  0x13   : > { %s3972_s8 = scalar_select %p3308_p6, 1, 0 }
  0x14   : > { %s227_s11 = sshll.u32 %s3210_s10, 4  ;;  %p2890_p9 = pneg %p3313_p8  ;;  %s3317_s11 = int_to_ptr.vmem [resolvable:$true] %s227_s11 }
  0x15   : > { %s3211_s13 = smov [#allocation7]   ;;  %s3975_s1 = sld [smem:[#allocation19_spill]] }
  0x16   : > { %p3324_p11 = pnand %p2890_p9, %p3956_p1  ;;  %s243_s14 = sshll.u32 %s3211_s13, 4  ;;  %s3328_s14 = int_to_ptr.vmem [resolvable:$true] %s243_s14 }
  0x18   : > { %p3020_p13 = pneg %p3324_p11 }
  0x1b   : > { %s3018_s17 = scalar_lea.hbm %s3975_s1, 256 }
  0x1c   : > { %p3019_p12 = scmp.ne.s32.totalorder %s3975_s1, %s3018_s17  ;;  %p3025_p5 = scmp.lt.u32.totalorder %s3018_s17, %s3975_s1 }
  0x1e   : > { %p3021_p0 = pnand %p3020_p13, %p3019_p12 }
  0x20   : > { %p3022_p3 = pneg %p3021_p0 }
  0x22   : > { %p3027_p7 = pnand %p3025_p5, %p3022_p3 }
  0x24   : > { %3030 = shalt.err (!%p3027_p7)
}
  0x25   : > { %s3031_s22 = scalar_lea.vmem %s3317_s11, 256  ;;  %p3039_p2 = scmp.lt.s32.totalorder %s3317_s11, %s3317_s11 }
  0x26   : > { %p3032_p9 = scmp.ne.s32.totalorder %s3317_s11, %s3031_s22  ;;  %p3040_p12 = scmp.lt.s32.totalorder %s3031_s22, %s3031_s22 }
  0x28   : > { %p3034_p10 = pnand %p3032_p9, %p3020_p13  ;;  %p3041_p0 = por %p3040_p12, %p3039_p2 }
  0x2a   : > { %p3035_p1 = pneg %p3034_p10 }
  0x2c   : > { %p3042_p6 = pnand %p3041_p0, %p3035_p1 }
  0x2e   : > { %3045 = shalt.err (!%p3042_p6)
}
  0x2f   : > { %s3957_s23 = smov 64   ;;  %s3959_s29 = smov 4  }
  0x30   : > { %2893 = dma.hbm_to_vmem [thread:$0]  (!%p3324_p11), %s3975_s1, 256, %s3317_s11, [#allocation6], %s3957_s23, %s3957_s23, %s3959_s29  }
  0x31   : > { %s3976_s3 = sld [smem:[#allocation20_spill]] }
  0x37   : > { %s3046_s17 = scalar_lea.hbm %s3976_s3, 1024 }
  0x38   : > { %p3047_p1 = scmp.ne.s32.totalorder %s3976_s3, %s3046_s17  ;;  %p3053_p10 = scmp.lt.u32.totalorder %s3046_s17, %s3976_s3 }
  0x3a   : > { %p3049_p2 = pnand %p3047_p1, %p3020_p13 }
  0x3c   : > { %p3050_p6 = pneg %p3049_p2 }
  0x3e   : > { %p3055_p3 = pnand %p3053_p10, %p3050_p6 }
  0x40   : > { %3058 = shalt.err (!%p3055_p3)
}
  0x41   : > { %s3059_s11 = scalar_lea.vmem %s3328_s14, 1024  ;;  %p3067_p12 = scmp.lt.s32.totalorder %s3328_s14, %s3328_s14 }
  0x42   : > { %p3060_p5 = scmp.ne.s32.totalorder %s3328_s14, %s3059_s11  ;;  %p3068_p0 = scmp.lt.s32.totalorder %s3059_s11, %s3059_s11 }
  0x44   : > { %p3062_p7 = pnand %p3060_p5, %p3020_p13  ;;  %p3069_p1 = por %p3068_p0, %p3067_p12 }
  0x46   : > { %p3063_p9 = pneg %p3062_p7 }
  0x48   : > { %p3070_p2 = pnand %p3069_p1, %p3063_p9 }
  0x4a   : > { %3073 = shalt.err (!%p3070_p2)
}
  0x4b   : > { %s3214_s22 = smov 128   ;;  %s3215_s10 = smov 8  }
  0x4c   : > { %2896 = dma.hbm_to_vmem [thread:$0]  (!%p3324_p11), %s3976_s3, 1024, %s3328_s14, [#allocation6], %s3214_s22, %s3214_s22, %s3215_s10  }
  0x4d   : > { %s3386_s16 = sadd.s32 1, %s3208_s27   ;;  %s34_s18 = sadd.s32 1, %s3204_s26 }
  0x4e   : > { %3977 = sst [smem:[#allocation16_spill]] %s3386_s16  ;;  %s31_s17 = ssub.s32 %s3208_s27, %s3386_s16 }
  0x4f   : > { %p32_p13 = scmp.eq.s32.totalorder %s31_s17, 0  ;;  %p41_p6 = scmp.ne.s32.totalorder %s3204_s26, %s3200_s25 }
  0x50   : > { %p42_p10 = scmp.eq.s32.totalorder %s3208_s27, 0  ;;  %p3979_p5 = scmp.eq.s32.totalorder %s3294_s28, 1 }
  0x51   : > { %s3395_s19 = scalar_select %p32_p13, %s3204_s26, %s34_s18  }
  0x52   : > { %p43_p3 = por %p42_p10, %p41_p6  ;;  %p3399_p7 = por %p3979_p5, %p41_p6 }
  0x53   : > { %3978 = sst [smem:[#allocation17_spill]] %s3395_s19  ;;  %p2910_p9 = scmp.lt.s32.totalorder %s3208_s27, 2 }
  0x54   : > { %s3980_s20 = scalar_select %p3399_p7, 1, 0 }
  0x55   : > { %s3405_s12 = sand.u32 1, %s3204_s26   ;;  %s2719_s21 = sshll.u32 %s3208_s27, 7 }
  0x56   : > { %s3961_s14 = sshll.u32 %s3405_s12, 3  ;;  %s3981_s0 = sld [smem:[#allocation18_spill]] }
  0x57   : > { %s267_s13 = scalar_lea.vmem [#allocation2], %s3961_s14  ;;  %p3418_p11 = pnand %p2910_p9, %p43_p3 }
  0x58   : > { %s274_s15 = sshll.u32 %s267_s13, 4  ;;  %s3425_s11 = scalar_lea.hbm %s3952_s4, %s2719_s21  ;;  %s3416_s15 = int_to_ptr.vmem [resolvable:$true] %s274_s15 }
  0x59   : > { %s264_s22 = scalar_lea.sflag [#allocation3], %s3405_s12  ;;  %p3076_p0 = pneg %p3418_p11 }
  0x5c   : > { %s3412_s10 = scalar_lea.hbm %s3981_s0, %s2719_s21  ;;  %s3079_s1 = scalar_lea.hbm %s3981_s0, 256 }
  0x5d   : > { %s3074_s29 = scalar_lea.hbm %s3412_s10, 128  ;;  %p3080_p13 = scmp.lt.u32.totalorder %s3412_s10, %s3981_s0 }
  0x5e   : > { %p3075_p12 = scmp.ne.s32.totalorder %s3412_s10, %s3074_s29  ;;  %p3081_p6 = scmp.lt.u32.totalorder %s3079_s1, %s3074_s29 }
  0x5f   : > { %p3083_p3 = scmp.lt.u32.totalorder %s3074_s29, %s3412_s10 }
  0x60   : > { %p3077_p1 = pnand %p3076_p0, %p3075_p12  ;;  %p3082_p10 = por %p3081_p6, %p3080_p13 }
  0x62   : > { %p3078_p2 = pneg %p3077_p1  ;;  %p3084_p5 = por %p3083_p3, %p3082_p10 }
  0x64   : > { %p3085_p9 = pnand %p3084_p5, %p3078_p2 }
  0x66   : > { %3088 = shalt.err (!%p3085_p9)
}
  0x67   : > { %s3089_s23 = scalar_lea.vmem %s3416_s15, 128  ;;  %s3216_s14 = smov [#allocation2]  }
  0x68   : > { %p3090_p12 = scmp.ne.s32.totalorder %s3416_s15, %s3089_s23  ;;  %s3094_s21 = sshll.u32 %s3216_s14, 4  ;;  %s3095_s21 = int_to_ptr.vmem [resolvable:$false] %s3094_s21 }
  0x69   : > { %s3096_s3 = scalar_lea.vmem %s3095_s21, 256  ;;  %p3097_p4 = scmp.lt.s32.totalorder %s3416_s15, %s3095_s21 }
  0x6a   : > { %p3092_p1 = pnand %p3090_p12, %p3076_p0  ;;  %p3098_p13 = scmp.lt.s32.totalorder %s3096_s3, %s3089_s23 }
  0x6c   : > { %p3093_p7 = pneg %p3092_p1  ;;  %p3099_p6 = por %p3098_p13, %p3097_p4 }
  0x6e   : > { %p3100_p10 = pnand %p3099_p6, %p3093_p7 }
  0x70   : > { %3103 = shalt.err (!%p3100_p10)
}
  0x71   : > { %s3983_s1 = smov 4   ;;  %s3984_s29 = smov 64  }
  0x72   : > { %2900 = dma.hbm_to_vmem [thread:$0]  (!%p3418_p11), %s3412_s10, 128, %s3416_s15, %s264_s22, %s3984_s29, %s3984_s29, %s3983_s1  }
  0x73   : > { %s3985_s19 = sshll.u32 %s3405_s12, 3  ;;  %s285_s23 = scalar_lea.sflag [#allocation9], %s3405_s12 }
  0x74   : > { %s288_s18 = scalar_lea.vmem [#allocation8], %s3985_s19  ;;  %s3104_s14 = scalar_lea.hbm %s3425_s11, 128 }
  0x75   : > { %s295_s13 = sshll.u32 %s288_s18, 4  ;;  %p3105_p4 = scmp.ne.s32.totalorder %s3425_s11, %s3104_s14  ;;  %s3460_s13 = int_to_ptr.vmem [resolvable:$true] %s295_s13 }
  0x76   : > { %s3109_s0 = scalar_lea.hbm %s3952_s4, 256  ;;  %p3110_p3 = scmp.lt.u32.totalorder %s3425_s11, %s3952_s4 }
  0x77   : > { %p3107_p7 = pnand %p3105_p4, %p3076_p0  ;;  %p3111_p5 = scmp.lt.u32.totalorder %s3109_s0, %s3104_s14 }
  0x78   : > { %p3113_p12 = scmp.lt.u32.totalorder %s3104_s14, %s3425_s11 }
  0x79   : > { %p3108_p2 = pneg %p3107_p7  ;;  %p3112_p9 = por %p3111_p5, %p3110_p3 }
  0x7b   : > { %p3114_p1 = por %p3113_p12, %p3112_p9 }
  0x7d   : > { %p3115_p13 = pnand %p3114_p1, %p3108_p2 }
  0x7f   : > { %3118 = shalt.err (!%p3115_p13)
}
  0x80   : > { %s3119_s10 = scalar_lea.vmem %s3460_s13, 128  ;;  %s3217_s15 = smov [#allocation8]  }
  0x81   : > { %p3120_p6 = scmp.ne.s32.totalorder %s3460_s13, %s3119_s10  ;;  %s3124_s22 = sshll.u32 %s3217_s15, 4  ;;  %s3125_s22 = int_to_ptr.vmem [resolvable:$false] %s3124_s22 }
  0x82   : > { %s3126_s26 = scalar_lea.vmem %s3125_s22, 256  ;;  %p3127_p7 = scmp.lt.s32.totalorder %s3460_s13, %s3125_s22 }
  0x83   : > { %p3122_p10 = pnand %p3120_p6, %p3076_p0  ;;  %p3128_p3 = scmp.lt.s32.totalorder %s3126_s26, %s3119_s10 }
  0x85   : > { %p3123_p4 = pneg %p3122_p10  ;;  %p3129_p5 = por %p3128_p3, %p3127_p7 }
  0x87   : > { %p3130_p9 = pnand %p3129_p5, %p3123_p4 }
  0x89   : > { %3133 = shalt.err (!%p3130_p9)
}
  0x8a   : > { %2903 = dma.hbm_to_vmem [thread:$0]  (!%p3418_p11), %s3425_s11, 128, %s3460_s13, %s285_s23, %s3984_s29, %s3984_s29, %s3983_s1  }
  0x8b   : > { %307 = sbr.rel (%p3313_p8) target bundleno = 1834 (0x72a), region = 48  ;;  %s3494_s0 = sand.u32 (!%p3313_p8), 1, %s3200_s25  }
  0x8c   : > { %s2668_s16 = sshll.u32 (!%p3313_p8), %s3494_s0, 3  ;;  %s310_s19 = scalar_lea.sflag (!%p3313_p8), [#allocation3], %s3494_s0 }
  0x8d   : > { %s313_s17 = scalar_lea.vmem (!%p3313_p8), [#allocation2], %s2668_s16  ;;  %p3986_p0 = scmp.ne.s32.totalorder (!%p3313_p8), %s3971_s30, 0 }
  0x92   : > { %3179 = dma.done.wait (%p3986_p0), %s310_s19, 128  }
  0x93   : > { %3181 = vsyncadd (%p3986_p0), %s310_s19, 4294967168  ;;  %p3987_p2 = scmp.eq.s32.totalorder %s3294_s28, 0 }
  0x95   : > { %3183 = dma.done.wait (%p3987_p2), [#allocation6], 1280   ;;  %p3988_p11 = pmov %p3987_p2 }
  0x96   : > { %s327_s9 = scalar_lea.sflag [#allocation9], %s3494_s0  ;;  %s3507_s12 = scalar_lea.vmem [#allocation8], %s2668_s16 }
  0x97   : > { %3185 = vsyncadd (%p3988_p11), [#allocation6], 4294966016 }
  0x98   : > { %3187 = dma.done.wait (%p3986_p0), %s327_s9, 128  }
  0x99   : > { %3189 = vsyncadd (%p3986_p0), %s327_s9, 4294967168  ;;  %v3218_v0 = vmov 0.0   ;;  %vm3219_vm0 = vmmov 0   ;;  %v2981_v1 = vld [vmem:[#allocation5] sm:$0xff]   ;;  %v2982_v2 = vld [vmem:[#allocation5 + $0x8] sm:$0xff]   ;;  %vm400_vm1 = vcmask 261120   ;;  %v479_v17 = vlaneseq }
  0x9a   : > { %2764 = vmatprep.subr.bf16.mxu0 %v3218_v0  ;;  %2768 = vmatprep.mubr.msk.bf16.mxu0 %vm3219_vm0, %v3218_v0  ;;  %v2983_v3 = vld [vmem:[%s313_s17] sm:$0xff]   ;;  %s3220_s1 = smov 104   ;;  %s3221_s29 = smov 120   ;;  %v3224_v15 = vmov 1983009808   ;;  %v3226_v39 = vmov 0  }
  0x9b   : > { %2772 = vmatprep.subr.bf16.mxu1 %v3218_v0  ;;  %2774 = vmatprep.mubr.msk.bf16.mxu1 %vm3219_vm0, %v3218_v0  ;;  %v2673_v4 = vld [vmem:[%s3950_s2] ss:$0 sm:$0xff]  ;;  %s3222_s18 = smov 96   ;;  %s3223_s13 = smov 112   ;;  %v477_v16 = vunpack.c.l.s4 %v3224_v15  ;;  %v480_v20 = vshrl.u32 %v479_v17, 7  ;;  %v3567_v40 = vpack.i.b16 %v3226_v39, %v3226_v39  ;;  %vm1291_vm2 = vcmask 64512  }
  0x9c   : > { %2765 = vmatpush3.bf16.msra.mxu0 %v2981_v1  ;;  %v3225_v23 = vmov 1934713408   ;;  %s3227_s23 = smov 64   ;;  %vm1787_vm3 = vcmask 1043456   ;;  %s3228_s15 = smov 16   ;;  %vm2451_vm4 = vcmask 130048  }
  0x9d   : > { %2766 = vmatprep.subr.bf16.mxu0 %v3218_v0  ;;  %v478_v19 = vunpack.c.0.s8 %v477_v16  ;;  %v508_v24 = vunpack.c.l.s4 %v3225_v23  ;;  %s3229_s22 = smov 8   ;;  %s3230_s26 = smov 24   ;;  %vm2454_vm5 = vcmask 195584  }
  0x9e   : > { %s2672_s16 = sshll.u32 %s3494_s0, 4  ;;  %s2721_s30 = sshll.u32 %s3294_s28, 8 }
  0x9f   : > { %v3550_v28 = vsub.s32 %v478_v19, %v480_v20  ;;  %v509_v31 = vunpack.c.0.s8 %v508_v24  ;;  %s365_s9 = scalar_lea.vmem [#allocation10], %s2672_s16  ;;  %s2528_s28 = scalar_lea.sflag [#allocation4], %s3494_s0 }
  0xa0   : > { %2767 = vmatpush3.bf16.msra.mxu0 %v2982_v2  ;;  %p3989_p12 = scmp.ne.s32.totalorder %s3980_s20, 0 }
  0xa1   : > { %2778 = vmatprep.subr.bf16.mxu0 %v3218_v0  ;;  %v3569_v42 = vsub.s32 %v509_v31, %v480_v20 }
  0xa3   : > { %2769 = vmatmul.mubr.msk.bf16.vlgmr.msra.gmra.mrb[0].mxu0 %vm400_vm1, %v2983_v3 }
  0xa4   : > { %2780 = vmatprep.mubr.msk.bf16.mxu0 %vm3219_vm0, %v3218_v0 }
 0x176   : > { %v438_v5 = vpop.f32.mrb[0].mxu0 }
 0x177   : > { %v2770_v6 = vpop.f32.mrb[1].mxu0  ;;  %v439_v8 = vadd.f32 %v2673_v4, %v438_v5 }
 0x178   : > { %v441_v7 = vpop.f32.mrb[2].mxu0 }
 0x179   : > { %v442_v9 = vadd.f32 %v2673_v4, %v441_v7  ;;  %v2771_v10 = vpop.f32.mrb[3].mxu0 }
 0x17b   : > { %v3527_v11 = vpack.c.bf16 %v442_v9, %v439_v8 }
 0x17d   : > { %451 = vrot.lane.b32.xlu1 %v3527_v11, %s3220_s1  ;;  %447 = vrot.lane.b32.xlu0 %v3527_v11, %s3221_s29  ;;  %v457_v26 = vshrl.u32 %v3527_v11, 16  ;;  %s3902_s29 = scalar_lea.hbm %s3955_s7, %s2721_s30 }
 0x181   : > { %731 = vrot.lane.b32.xlu1 %v3527_v11, %s3222_s18  ;;  %449 = vrot.lane.b32.xlu0 %v3527_v11, %s3223_s13  ;;  %s3231_s13 = smov [#allocation10]  }
 0x1ef   : > { %v3533_v12 = vpop.permute.xlu0 %447  ;;  %v3536_v13 = vpop.permute.xlu1 %451 }
 0x1f0   : > { %733 = vrot.lane.b32.xlu0 %v3533_v12, %s3222_s18  ;;  %v466_v21 = vshrl.u32 %v3536_v13, 16  ;;  %v458_v22 = vshrl.u32 %v3533_v12, 16  ;;  %v3554_v29 = vpack.i.b16 %v3533_v12, %v3527_v11 }
 0x1f2   : > { %v3556_v30 = vpack.i.b16 %v458_v22, %v457_v26  ;;  %v482_v35 = vrot.slane %v3554_v29, %v3550_v28  ;;  %v475_v53 = vcombine.high %v3554_v29, %v3567_v40 }
 0x1f3   : > { %v3538_v14 = vpop.permute.xlu0 %449  ;;  %v732_v33 = vpop.permute.xlu1 %731 }
 0x1f4   : > { %737 = vrot.lane.b32.xlu0 %v3536_v13, %s3222_s18  ;;  %735 = vrot.lane.b32.xlu1 %v3538_v14, %s3222_s18  ;;  %v465_v18 = vshrl.u32 %v3538_v14, 16  ;;  %v3547_v25 = vpack.i.b16 %v3536_v13, %v3538_v14  ;;  %v548_v37 = vrot.slane %v3556_v30, %v3550_v28  ;;  %v743_v41 = vshrl.u32 %v732_v33, 16 }
 0x1f5   : > { %v541_v2 = vcombine.high %v3556_v30, %v3567_v40 }
 0x1f6   : > { %v467_v27 = vpack.i.b16 %v466_v21, %v465_v18  ;;  %v497_v32 = vrot.slane %v3547_v25, %v3550_v28  ;;  %v490_v3 = vcombine.high %v3547_v25, %v3567_v40 }
 0x1f8   : > { %v563_v34 = vrot.slane %v467_v27, %v3550_v28  ;;  %v505_v43 = vcombine.low %v482_v35, %v497_v32  ;;  %v506_v44 = vcombine.high %v482_v35, %v497_v32  ;;  %v556_v50 = vcombine.high %v467_v27, %v3567_v40 }
 0x1fa   : > { %v571_v45 = vcombine.low %v548_v37, %v563_v34  ;;  %v572_v46 = vcombine.high %v548_v37, %v563_v34  ;;  %v513_v54 = vrot.slane %v505_v43, %v3569_v42  ;;  %v520_v57 = vrot.slane %v506_v44, %v3569_v42 }
 0x1fb   : > { %v3587_v4 = vrot.slane %v556_v50, %v3550_v28  ;;  %v555_v50 = vrot.slane %v541_v2, %v3550_v28 }
 0x1fc   : > { %v579_v58 = vrot.slane %v571_v45, %v3569_v42  ;;  %v586_v59 = vrot.slane %v572_v46, %v3569_v42  ;;  %v607_v10 = vcombine.low %v513_v54, %v520_v57  ;;  %v2678_v35 = vcombine.high %v513_v54, %v520_v57 }
 0x1fe   : > { %v632_v15 = vcombine.low %v579_v58, %v586_v59  ;;  %v2679_v18 = vcombine.high %v579_v58, %v586_v59  ;;  %v489_v59 = vrot.slane %v475_v53, %v3550_v28 }
 0x262   : > { %v734_v36 = vpop.permute.xlu0 %733 }
 0x263   : > { %v744_v38 = vshrl.u32 %v734_v36, 16  ;;  %v741_v47 = vpack.i.b16 %v734_v36, %v732_v33 }
 0x265   : > { %v745_v51 = vpack.i.b16 %v744_v38, %v743_v41  ;;  %v755_v60 = vcombine.high %v741_v47, %v3567_v40  ;;  %v762_v61 = vrot.slane %v741_v47, %v3550_v28  ;;  %v639_v38 = vrot.slane %v632_v15, %v3550_v28 }
 0x266   : > { %v736_v48 = vpop.permute.xlu1 %735  ;;  %v738_v49 = vpop.permute.xlu0 %737 }
 0x267   : > { %v751_v52 = vshrl.u32 %v736_v48, 16  ;;  %v749_v55 = vpack.i.b16 %v738_v49, %v736_v48  ;;  %v752_v56 = vshrl.u32 %v738_v49, 16  ;;  %v821_v5 = vcombine.high %v745_v51, %v3567_v40 }
 0x268   : > { %v828_v16 = vrot.slane %v745_v51, %v3550_v28  ;;  %v769_v19 = vrot.slane %v755_v60, %v3550_v28  ;;  %v647_v49 = vrot.slane %v2679_v18, %v3550_v28  ;;  %v504_v51 = vrot.slane %v490_v3, %v3550_v28 }
 0x269   : > { %v753_v62 = vpack.i.b16 %v752_v56, %v751_v52  ;;  %v770_v63 = vcombine.high %v749_v55, %v3567_v40  ;;  %v777_v1 = vrot.slane %v749_v55, %v3550_v28  ;;  %v835_v22 = vrot.slane %v821_v5, %v3550_v28 }
 0x26a   : > { %v614_v55 = vrot.slane %v607_v10, %v3550_v28  ;;  %v622_v56 = vrot.slane %v2678_v35, %v3550_v28  ;;  %v648_v2 = vcombine.low %v639_v38, %v647_v49  ;;  %v521_v3 = vcombine.low %v489_v59, %v504_v51 }
 0x26b   : > { %v784_v6 = vrot.slane %v770_v63, %v3550_v28  ;;  %v785_v7 = vcombine.low %v762_v61, %v777_v1  ;;  %v786_v8 = vcombine.high %v762_v61, %v777_v1  ;;  %v836_v9 = vcombine.high %v753_v62, %v3567_v40 }
 0x26c   : > { %v843_v17 = vrot.slane %v753_v62, %v3550_v28  ;;  %v587_v62 = vcombine.low %v555_v50, %v3587_v4  ;;  %v588_v63 = vcombine.high %v555_v50, %v3587_v4  ;;  %v522_v5 = vcombine.high %v489_v59, %v504_v51 }
 0x26d   : > { %v793_v20 = vrot.slane %v785_v7, %v3569_v42  ;;  %v800_v21 = vrot.slane %v786_v8, %v3569_v42  ;;  %v850_v23 = vrot.slane %v836_v9, %v3550_v28  ;;  %v801_v26 = vcombine.low %v769_v19, %v784_v6 }
 0x26e   : > { %v851_v24 = vcombine.low %v828_v16, %v843_v17  ;;  %v852_v25 = vcombine.high %v828_v16, %v843_v17  ;;  %v802_v27 = vcombine.high %v769_v19, %v784_v6  ;;  %v623_v8 = vcombine.low %v614_v55, %v622_v56 }
 0x26f   : > { %v887_v29 = vcombine.low %v793_v20, %v800_v21  ;;  %v2682_v30 = vcombine.high %v793_v20, %v800_v21  ;;  %v867_v33 = vcombine.low %v835_v22, %v850_v23  ;;  %v868_v34 = vcombine.high %v835_v22, %v850_v23 }
 0x270   : > { %v859_v31 = vrot.slane %v851_v24, %v3569_v42  ;;  %v866_v32 = vrot.slane %v852_v25, %v3569_v42  ;;  %v809_v46 = vrot.slane %v801_v26, %v3569_v42  ;;  %v816_v47 = vrot.slane %v802_v27, %v3569_v42 }
 0x271   : > { %v894_v36 = vrot.slane %v887_v29, %v3550_v28  ;;  %v902_v37 = vrot.slane %v2682_v30, %v3550_v28  ;;  %v875_v41 = vrot.slane %v867_v33, %v3569_v42  ;;  %v882_v43 = vrot.slane %v868_v34, %v3569_v42 }
 0x272   : > { %v912_v44 = vcombine.low %v859_v31, %v866_v32  ;;  %v2683_v45 = vcombine.high %v859_v31, %v866_v32  ;;  %v937_v1 = vcombine.low %v809_v46, %v816_v47  ;;  %v2684_v6 = vcombine.high %v809_v46, %v816_v47 }
 0x273   : > { %v903_v48 = vcombine.low %v894_v36, %v902_v37  ;;  %v962_v57 = vcombine.low %v875_v41, %v882_v43  ;;  %v2685_v58 = vcombine.high %v875_v41, %v882_v43  ;;  %v595_v4 = vrot.slane %v587_v62, %v3569_v42 }
 0x274   : > { %v919_v52 = vrot.slane %v912_v44, %v3550_v28  ;;  %v927_v54 = vrot.slane %v2683_v45, %v3550_v28  ;;  %v602_v18 = vrot.slane %v588_v63, %v3569_v42  ;;  %v944_v19 = vrot.slane %v937_v1, %v3550_v28 }
 0x275   : > { %v910_v60 = vrot.slane %v903_v48, %v3569_v42  ;;  %v969_v9 = vrot.slane %v962_v57, %v3550_v28  ;;  %v977_v53 = vrot.slane %v2685_v58, %v3550_v28  ;;  %v655_v20 = vrot.slane %v648_v2, %v3569_v42 }
 0x276   : > { %v928_v61 = vcombine.low %v919_v52, %v927_v54  ;;  %v952_v21 = vrot.slane %v2684_v6, %v3550_v28  ;;  %v529_v25 = vrot.slane %v521_v3, %v3569_v42  ;;  %v536_v26 = vrot.slane %v522_v5, %v3569_v42 }
 0x277   : > { %v990_v15 = vshrl.u32 %v910_v60, 16  ;;  %v911_v24 = vcombine.high %v910_v60, %v3226_v39  ;;  %v630_v29 = vrot.slane %v623_v8, %v3569_v42  ;;  %v978_v31 = vcombine.low %v969_v9, %v977_v53 }
 0x278   : > { %v935_v7 = vrot.slane %v928_v61, %v3569_v42  ;;  %v682_v32 = vcombine.low %v595_v4, %v602_v18  ;;  %v2681_v33 = vcombine.high %v595_v4, %v602_v18  ;;  %v711_v35 = vshrl.u32 %v655_v20, 16 }
 0x279   : > { %v996_v36 = vshrl.u32 %v911_v24, 16  ;;  %v953_v37 = vcombine.low %v944_v19, %v952_v21  ;;  %v657_v38 = vcombine.low %v529_v25, %v536_v26  ;;  %v2680_v41 = vcombine.high %v529_v25, %v536_v26 }
 0x27a   : > { %v989_v10 = vpack.i.b16 %v935_v7, %v910_v60  ;;  %v991_v16 = vshrl.u32 %v935_v7, 16  ;;  %v936_v17 = vcombine.high %v935_v7, %v3226_v39  ;;  %v709_v43 = vpack.i.b16 %v655_v20, %v630_v29 }
 0x27b   : > { %v710_v44 = vshrl.u32 %v630_v29, 16  ;;  %v985_v46 = vrot.slane %v978_v31, %v3569_v42  ;;  %v689_v47 = vrot.slane %v682_v32, %v3550_v28  ;;  %v697_v48 = vrot.slane %v2681_v33, %v3550_v28  ;;  %v2723_v31 = vld [vmem:[%s3507_s12] sm:$0xff]   ;;  %s2541_s12 = sshll.u32 %s365_s9, 4  ;;  %s3896_s12 = int_to_ptr.vmem [resolvable:$true] %s2541_s12 }
 0x27c   : > { %v1296_v22 = vsel %vm1291_vm2, %v989_v10, 0  ;;  %v992_v23 = vpack.i.b16 %v991_v16, %v990_v15  ;;  %v997_v30 = vshrl.u32 %v936_v17, 16  ;;  %v995_v34 = vpack.i.b16 %v936_v17, %v911_v24  ;;  %v1660_v32 = vld [vmem:[#allocation7] sm:$0xff]  ;;  %s3134_s18 = scalar_lea.vmem %s3896_s12, 256 }
 0x27d   : > { %2773 = vmatpush3.bf16.xpose.msra.mxu1 %v1296_v22  ;;  %v712_v50 = vpack.i.b16 %v711_v35, %v710_v44  ;;  %v656_v51 = vcombine.high %v655_v20, %v3226_v39  ;;  %v960_v52 = vrot.slane %v953_v37, %v3569_v42  ;;  %v664_v54 = vrot.slane %v657_v38, %v3550_v28  ;;  %v1661_v35 = vld [vmem:[#allocation7 + $0x8] sm:$0xff]  ;;  %p3135_p8 = scmp.ne.s32.totalorder %s3896_s12, %s3134_s18 }
 0x27e   : > { %v1342_v27 = vsel %vm1291_vm2, %v992_v23, 0  ;;  %2784 = vmatprep.subr.bf16.mxu1 %v3218_v0  ;;  %v998_v45 = vpack.i.b16 %v997_v30, %v996_v36  ;;  %v1388_v49 = vsel %vm1291_vm2, %v995_v34, 0  ;;  %v672_v55 = vrot.slane %v2680_v41, %v3550_v28 }
 0x27f   : > { %2779 = vmatpush3.bf16.xpose.msra.mxu0 %v1342_v27  ;;  %v631_v57 = vcombine.high %v630_v29, %v3226_v39  ;;  %v1003_v58 = vshrl.u32 %v985_v46, 16  ;;  %v1001_v59 = vpack.i.b16 %v985_v46, %v960_v52  ;;  %v717_v60 = vshrl.u32 %v656_v51, 16  ;;  %p3136_p1 = pnand %p3135_p8, %p3989_p12 }
 0x280   : > { %2790 = vmatprep.subr.bf16.mxu0 %v3218_v0  ;;  %v1434_v56 = vsel %vm1291_vm2, %v998_v45, 0  ;;  %v1002_v61 = vshrl.u32 %v960_v52, 16  ;;  %v698_v62 = vcombine.low %v689_v47, %v697_v48  ;;  %v673_v63 = vcombine.low %v664_v54, %v672_v55  ;;  %v1663_v55 = vld [vmem:[#allocation7 + $0x18] sm:$0xff] }
 0x281   : > { %v715_v1 = vpack.i.b16 %v656_v51, %v631_v57  ;;  %v716_v2 = vshrl.u32 %v631_v57, 16  ;;  %v986_v5 = vcombine.high %v985_v46, %v3226_v39  ;;  %v1480_v6 = vsel %vm1291_vm2, %v1001_v59, 0  ;;  %v1662_v51 = vld [vmem:[#allocation7 + $0x10] sm:$0xff]  ;;  %p3137_p13 = pneg %p3136_p1 }
 0x282   : > { %v1004_v3 = vpack.i.b16 %v1003_v58, %v1002_v61  ;;  %v705_v8 = vrot.slane %v698_v62, %v3569_v42  ;;  %v961_v9 = vcombine.high %v960_v52, %v3226_v39  ;;  %v680_v10 = vrot.slane %v673_v63, %v3569_v42 }
 0x283   : > { %v718_v7 = vpack.i.b16 %v717_v60, %v716_v2  ;;  %v1009_v15 = vshrl.u32 %v986_v5, 16  ;;  %v2724_v33 = vunpack.c.l.bf16 %v2723_v31 }
 0x284   : > { %2775 = vmatmul.mubr.msk.bf16.vlgmr.msra.gmra.mrb[0].mxu1 %vm1291_vm2, %v709_v43  ;;  %v1526_v53 = vsel %vm1291_vm2, %v1004_v3, 0  ;;  %v1007_v16 = vpack.i.b16 %v986_v5, %v961_v9  ;;  %v723_v17 = vshrl.u32 %v705_v8, 16  ;;  %v1008_v4 = vshrl.u32 %v961_v9, 16 }
 0x285   : > { %2785 = vmatpush3.bf16.xpose.msra.mxu1 %v1388_v49  ;;  %2786 = vmatprep.mubr.msk.bf16.mxu1 %vm3219_vm0, %v3218_v0  ;;  %v721_v18 = vpack.i.b16 %v705_v8, %v680_v10  ;;  %v722_v19 = vshrl.u32 %v680_v10, 16  ;;  %v706_v23 = vcombine.high %v705_v8, %v3226_v39  ;;  %v681_v25 = vcombine.high %v680_v10, %v3226_v39 }
 0x286   : > { %2781 = vmatmul.mubr.msk.bf16.vlgmr.msra.gmra.mrb[4].mxu0 %vm1291_vm2, %v712_v50  ;;  %2796 = vmatprep.subr.bf16.mxu1 %v3218_v0  ;;  %v1010_v20 = vpack.i.b16 %v1009_v15, %v1008_v4  ;;  %v1572_v21 = vsel %vm1291_vm2, %v1007_v16, 0  ;;  %v2725_v8 = vunpack.c.h.bf16 %v2723_v31 }
 0x287   : > { %2791 = vmatpush3.bf16.xpose.msra.mxu0 %v1434_v56  ;;  %2792 = vmatprep.mubr.msk.bf16.mxu0 %vm3219_vm0, %v3218_v0  ;;  %v724_v22 = vpack.i.b16 %v723_v17, %v722_v19  ;;  %v729_v26 = vshrl.u32 %v706_v23, 16  ;;  %v727_v27 = vpack.i.b16 %v706_v23, %v681_v25  ;;  %v728_v29 = vshrl.u32 %v681_v25, 16  ;;  %v1666_v25 = vld [vmem:[#allocation7 + $0x30] sm:$0xff] }
 0x288   : > { %2802 = vmatprep.subr.bf16.mxu0 %v3218_v0  ;;  %v1618_v24 = vsel %vm1291_vm2, %v1010_v20, 0 }
 0x289   : > { %v730_v30 = vpack.i.b16 %v729_v26, %v728_v29  ;;  %v1667_v29 = vld [vmem:[#allocation7 + $0x38] sm:$0xff] }
 0x28c   : > { %2787 = vmatmul.mubr.msk.bf16.vlgmr.msra.gmra.mrb[4].mxu1 %vm1291_vm2, %v715_v1 }
 0x28d   : > { %2797 = vmatpush3.bf16.xpose.msra.mxu1 %v1480_v6  ;;  %2798 = vmatprep.mubr.msk.bf16.mxu1 %vm3219_vm0, %v3218_v0  ;;  %v1664_v6 = vld [vmem:[#allocation7 + $0x20] sm:$0xff] }
 0x28e   : > { %2793 = vmatmul.mubr.msk.bf16.vlgmr.msra.gmra.mrb[8].mxu0 %vm1291_vm2, %v718_v7  ;;  %2808 = vmatprep.subr.bf16.mxu1 %v3218_v0 }
 0x28f   : > { %2803 = vmatpush3.bf16.xpose.msra.mxu0 %v1526_v53  ;;  %2804 = vmatprep.mubr.msk.bf16.mxu0 %vm3219_vm0, %v3218_v0  ;;  %v1665_v53 = vld [vmem:[#allocation7 + $0x28] sm:$0xff] }
 0x290   : > { %2814 = vmatprep.subr.bf16.mxu0 %v3218_v0 }
 0x294   : > { %2799 = vmatmul.mubr.msk.bf16.vlgmr.msra.gmra.mrb[8].mxu1 %vm1291_vm2, %v721_v18 }
 0x295   : > { %2809 = vmatpush3.bf16.xpose.msra.mxu1 %v1572_v21  ;;  %2810 = vmatprep.mubr.msk.bf16.mxu1 %vm3219_vm0, %v3218_v0 }
 0x296   : > { %2805 = vmatmul.mubr.msk.bf16.vlgmr.msra.gmra.mrb[12].mxu0 %vm1291_vm2, %v724_v22  ;;  %2820 = vmatprep.subr.bf16.mxu1 %v3218_v0 }
 0x297   : > { %2815 = vmatpush3.bf16.xpose.msra.mxu0 %v1618_v24  ;;  %2816 = vmatprep.mubr.msk.bf16.mxu0 %vm3219_vm0, %v3218_v0 }
 0x298   : > { %2826 = vmatprep.subr.bf16.mxu0 %v3218_v0 }
 0x29c   : > { %2811 = vmatmul.mubr.msk.bf16.vlgmr.msra.gmra.mrb[12].mxu1 %vm1291_vm2, %v727_v27 }
 0x29d   : > { %2822 = vmatprep.mubr.msk.bf16.mxu1 %vm3219_vm0, %v3218_v0 }
 0x29e   : > { %2817 = vmatmul.mubr.msk.bf16.vlgmr.msra.gmra.mrb[16].mxu0 %vm1291_vm2, %v730_v30 }
 0x29f   : > { %2828 = vmatprep.mubr.msk.bf16.mxu0 %vm3219_vm0, %v3218_v0 }
 0x357   : > { %v1332_v34 = vpop.f32.mrb[0].mxu1 }
 0x358   : > { %v1668_v36 = vadd.f32 %v1660_v32, %v1332_v34  ;;  %v2776_v37 = vpop.f32.mrb[1].mxu1 }
 0x359   : > { %v1335_v38 = vpop.f32.mrb[2].mxu1  ;;  %v1378_v41 = vpop.f32.mrb[4].mxu0 }
 0x35a   : > { %v1669_v43 = vadd.f32 %v1661_v35, %v1378_v41  ;;  %v2777_v44 = vpop.f32.mrb[3].mxu1  ;;  %v2782_v45 = vpop.f32.mrb[5].mxu0  ;;  %v3687_v46 = vadd.f32 %v2724_v33, %v1668_v36 }
 0x35b   : > { %v1381_v47 = vpop.f32.mrb[6].mxu0 }
 0x35c   : > { %v2783_v48 = vpop.f32.mrb[7].mxu0  ;;  %v1688_v49 = vsel %vm1291_vm2, %v3687_v46, -inf  ;;  %v3691_v50 = vadd.f32 %v2724_v33, %v1669_v43 }
 0x35d   : > { %1689 = vmax.xlane.f32.xlu1 %v1688_v49 }
 0x35e   : > { %v1691_v52 = vsel %vm1291_vm2, %v3691_v50, -inf }
 0x35f   : > { %v1424_v54 = vpop.f32.mrb[4].mxu1  ;;  %1692 = vmax.xlane.f32.xlu0 %v1691_v52 }
 0x360   : > { %v1670_v56 = vadd.f32 %v1662_v51, %v1424_v54  ;;  %v2788_v57 = vpop.f32.mrb[5].mxu1 }
 0x361   : > { %v1427_v58 = vpop.f32.mrb[6].mxu1  ;;  %v1470_v59 = vpop.f32.mrb[8].mxu0 }
 0x362   : > { %v1671_v60 = vadd.f32 %v1663_v55, %v1470_v59  ;;  %v2789_v61 = vpop.f32.mrb[7].mxu1  ;;  %v2794_v62 = vpop.f32.mrb[9].mxu0  ;;  %v3695_v63 = vadd.f32 %v2724_v33, %v1670_v56 }
 0x363   : > { %v1473_v1 = vpop.f32.mrb[10].mxu0 }
 0x364   : > { %v2795_v2 = vpop.f32.mrb[11].mxu0  ;;  %v1694_v3 = vsel %vm1291_vm2, %v3695_v63, -inf  ;;  %v3699_v5 = vadd.f32 %v2724_v33, %v1671_v60 }
 0x365   : > { %1695 = vmax.xlane.f32.xlu0 %v1694_v3 }
 0x366   : > { %v1697_v7 = vsel %vm1291_vm2, %v3699_v5, -inf }
 0x367   : > { %v1516_v9 = vpop.f32.mrb[8].mxu1  ;;  %1698 = vmax.xlane.f32.xlu1 %v1697_v7 }
 0x368   : > { %v1672_v10 = vadd.f32 %v1664_v6, %v1516_v9  ;;  %v2800_v15 = vpop.f32.mrb[9].mxu1 }
 0x369   : > { %v1519_v16 = vpop.f32.mrb[10].mxu1  ;;  %v1562_v17 = vpop.f32.mrb[12].mxu0 }
 0x36a   : > { %v1673_v4 = vadd.f32 %v1665_v53, %v1562_v17  ;;  %v2801_v18 = vpop.f32.mrb[11].mxu1  ;;  %v2806_v19 = vpop.f32.mrb[13].mxu0  ;;  %v1684_v20 = vadd.f32 %v2725_v8, %v1672_v10 }
 0x36b   : > { %v1565_v21 = vpop.f32.mrb[14].mxu0 }
 0x36c   : > { %v2807_v22 = vpop.f32.mrb[15].mxu0  ;;  %v1700_v23 = vsel %vm1291_vm2, %v1684_v20, -inf  ;;  %v1685_v24 = vadd.f32 %v2725_v8, %v1673_v4 }
 0x36d   : > { %1701 = vmax.xlane.f32.xlu0 %v1700_v23 }
 0x36e   : > { %v1703_v26 = vsel %vm1291_vm2, %v1685_v24, -inf }
 0x36f   : > { %v1608_v27 = vpop.f32.mrb[12].mxu1  ;;  %1704 = vmax.xlane.f32.xlu1 %v1703_v26 }
 0x370   : > { %v1674_v30 = vadd.f32 %v1666_v25, %v1608_v27  ;;  %v2812_v31 = vpop.f32.mrb[13].mxu1 }
 0x371   : > { %v1611_v32 = vpop.f32.mrb[14].mxu1  ;;  %v1654_v33 = vpop.f32.mrb[16].mxu0 }
 0x372   : > { %v1675_v34 = vadd.f32 %v1667_v29, %v1654_v33  ;;  %v2813_v35 = vpop.f32.mrb[15].mxu1  ;;  %v2818_v36 = vpop.f32.mrb[17].mxu0  ;;  %v1686_v37 = vadd.f32 %v2725_v8, %v1674_v30 }
 0x373   : > { %v1657_v38 = vpop.f32.mrb[18].mxu0 }
 0x374   : > { %v2819_v41 = vpop.f32.mrb[19].mxu0  ;;  %v1706_v43 = vsel %vm1291_vm2, %v1686_v37, -inf  ;;  %v1687_v44 = vadd.f32 %v2725_v8, %v1675_v34 }
 0x375   : > { %1707 = vmax.xlane.f32.xlu0 %v1706_v43 }
 0x376   : > { %v1709_v45 = vsel %vm1291_vm2, %v1687_v44, -inf }
 0x377   : > { %1710 = vmax.xlane.f32.xlu1 %v1709_v45 }
 0x388   : > { %1013 = vrot.lane.b32.xlu1 %v3533_v12, %s3227_s23 }
 0x38b   : > { %1011 = vrot.lane.b32.xlu0 %v3527_v11, %s3227_s23 }
 0x3ea   : > { %v1690_v47 = vpop.xlane.xlu1 %1689 }
 0x3eb   : > { %v1712_v48 = vsub.f32 %v3687_v46, %v1690_v47 }
 0x3ec   : > { %v1693_v49 = vpop.xlane.xlu0 %1692 }
 0x3ed   : > { %v1720_v51 = vmul.f32 1.442695, %v1712_v48  ;;  %v1713_v52 = vsub.f32 %v3691_v50, %v1693_v49 }
 0x3ef   : > { %2986 = vpow2.f32 %v1720_v51  ;;  %v1722_v54 = vmul.f32 1.442695, %v1713_v52 }
 0x3f1   : > { %2988 = vpow2.f32 %v1722_v54 }
 0x3f2   : > { %v1696_v12 = vpop.xlane.xlu0 %1695 }
 0x3f3   : > { %v1714_v59 = vsub.f32 %v3695_v63, %v1696_v12 }
 0x3f4   : > { %v1699_v46 = vpop.xlane.xlu1 %1698 }
 0x3f5   : > { %v1715_v50 = vsub.f32 %v3699_v5, %v1699_v46  ;;  %v1724_v2 = vmul.f32 1.442695, %v1714_v59 }
 0x3f7   : > { %v1726_v61 = vmul.f32 1.442695, %v1715_v50 }
 0x3f9   : > { %v3711_v55 = vpop.eup %2986  ;;  %2990 = vpow2.f32 %v1726_v61 }
 0x3fa   : > { %v1736_v56 = vsel %vm1291_vm2, %v3711_v55, 0.0  ;;  %v1702_v58 = vpop.xlane.xlu0 %1701  ;;  %2992 = vpow2.f32 %v1724_v2 }
 0x3fb   : > { %v3715_v57 = vpop.eup %2988  ;;  %1737 = vadd.xlane.f32.xlu0 %v1736_v56  ;;  %v1716_v62 = vsub.f32 %v1684_v20, %v1702_v58 }
 0x3fc   : > { %v1739_v11 = vsel %vm1291_vm2, %v3715_v57, 0.0  ;;  %v1705_v60 = vpop.xlane.xlu1 %1704 }
 0x3fd   : > { %1740 = vadd.xlane.f32.xlu1 %v1739_v11  ;;  %v1717_v3 = vsub.f32 %v1685_v24, %v1705_v60  ;;  %v1728_v7 = vmul.f32 1.442695, %v1716_v62 }
 0x3ff   : > { %2994 = vpow2.f32 %v1728_v7 }
 0x402   : > { %v1708_v1 = vpop.xlane.xlu0 %1707 }
 0x403   : > { %v1718_v8 = vsub.f32 %v1686_v37, %v1708_v1  ;;  %v3723_v53 = vpop.eup %2990 }
 0x404   : > { %v1711_v6 = vpop.xlane.xlu1 %1710  ;;  %v3725_v63 = vpop.eup %2992  ;;  %v1745_v10 = vsel %vm1291_vm2, %v3723_v53, 0.0 }
 0x405   : > { %v1732_v9 = vmul.f32 1.442695, %v1718_v8  ;;  %v1742_v16 = vsel %vm1291_vm2, %v3725_v63, 0.0 }
 0x406   : > { %v1012_v23 = vpop.permute.xlu0 %1011 }
 0x407   : > { %v1023_v31 = vshrl.u32 %v1012_v23, 16 }
 0x408   : > { %v1014_v24 = vpop.permute.xlu1 %1013 }
 0x409   : > { %v3729_v15 = vpop.eup %2994  ;;  %v1024_v27 = vshrl.u32 %v1014_v24, 16  ;;  %v3747_v30 = vpack.i.b16 %v1014_v24, %v1012_v23 }
 0x40a   : > { %v1748_v4 = vsel %vm1291_vm2, %v3729_v15, 0.0 }
 0x40b   : > { %v3751_v36 = vpack.i.b16 %v1024_v27, %v1023_v31  ;;  %v1042_v37 = vrot.slane %v3747_v30, %v3550_v28 }
 0x40d   : > { %v1108_v45 = vrot.slane %v3751_v36, %v3550_v28  ;;  %v1101_v27 = vcombine.high %v3751_v36, %v3567_v40 }
 0x40e   : > { %1015 = vrot.lane.b32.xlu1 %v3538_v14, %s3227_s23  ;;  %v1730_v14 = vmul.f32 1.442695, %v1717_v3 }
 0x410   : > { %2996 = vpow2.f32 %v1730_v14 }
 0x411   : > { %1017 = vrot.lane.b32.xlu0 %v3536_v13, %s3227_s23  ;;  %v1719_v13 = vsub.f32 %v1687_v44, %v1711_v6  ;;  %2998 = vpow2.f32 %v1732_v9  ;;  %s3138_s23 = sshll.u32 %s3231_s13, 4  ;;  %s3139_s23 = int_to_ptr.vmem [resolvable:$false] %s3138_s23 }
 0x412   : > { %s3140_s14 = scalar_lea.vmem %s3139_s23, 512  ;;  %p3141_p6 = scmp.lt.s32.totalorder %s3896_s12, %s3139_s23 }
 0x413   : > { %v1734_v5 = vmul.f32 1.442695, %v1719_v13  ;;  %p3142_p10 = scmp.lt.s32.totalorder %s3140_s14, %s3134_s18 }
 0x415   : > { %3000 = vpow2.f32 %v1734_v5  ;;  %p3143_p4 = por %p3142_p10, %p3141_p6 }
 0x417   : > { %p3144_p7 = pnand %p3143_p4, %p3137_p13 }
 0x41a   : > { %v3733_v17 = vpop.eup %2996 }
 0x41b   : > { %v3737_v18 = vpop.eup %2998  ;;  %v1751_v19 = vsel %vm1291_vm2, %v3733_v17, 0.0 }
 0x41c   : > { %v1754_v21 = vsel %vm1291_vm2, %v3737_v18, 0.0 }
 0x41f   : > { %v3741_v20 = vpop.eup %3000 }
 0x420   : > { %v1757_v22 = vsel %vm1291_vm2, %v3741_v20, 0.0 }
 0x430   : > { %1746 = vadd.xlane.f32.xlu0 %v1745_v10 }
 0x432   : > { %1743 = vadd.xlane.f32.xlu1 %v1742_v16 }
 0x434   : > { %1749 = vadd.xlane.f32.xlu0 %v1748_v4 }
 0x436   : > { %1752 = vadd.xlane.f32.xlu1 %v1751_v19 }
 0x438   : > { %1755 = vadd.xlane.f32.xlu0 %v1754_v21 }
 0x43a   : > { %1758 = vadd.xlane.f32.xlu1 %v1757_v22 }
 0x488   : > { %v1738_v25 = vpop.xlane.xlu0 %1737 }
 0x489   : > { %3002 = vrcp.f32 %v1738_v25 }
 0x48a   : > { %v1741_v26 = vpop.xlane.xlu1 %1740 }
 0x48b   : > { %3004 = vrcp.f32 %v1741_v26 }
 0x48c   : > { %v1018_v29 = vpop.permute.xlu0 %1017 }
 0x48d   : > { %v1032_v33 = vshrl.u32 %v1018_v29, 16 }
 0x48e   : > { %v1016_v32 = vpop.permute.xlu1 %1015 }
 0x48f   : > { %v3749_v34 = vpack.i.b16 %v1018_v29, %v1016_v32  ;;  %v1031_v35 = vshrl.u32 %v1016_v32, 16  ;;  %v1035_v32 = vcombine.high %v3747_v30, %v3567_v40 }
 0x491   : > { %v1033_v38 = vpack.i.b16 %v1032_v33, %v1031_v35  ;;  %v1057_v41 = vrot.slane %v3749_v34, %v3550_v28  ;;  %v1115_v35 = vrot.slane %v1101_v27, %v3550_v28 }
 0x493   : > { %v1065_v43 = vcombine.low %v1042_v37, %v1057_v41  ;;  %v1066_v44 = vcombine.high %v1042_v37, %v1057_v41  ;;  %v1123_v47 = vrot.slane %v1033_v38, %v3550_v28  ;;  %v3003_v2 = vpop.eup %3002  ;;  %v1116_v24 = vcombine.high %v1033_v38, %v3567_v40 }
 0x494   : > { %v1768_v14 = vmul.f32 %v3003_v2, %v3711_v55 }
 0x495   : > { %v1073_v48 = vrot.slane %v1065_v43, %v3569_v42  ;;  %v1080_v49 = vrot.slane %v1066_v44, %v3569_v42  ;;  %v1131_v51 = vcombine.low %v1108_v45, %v1123_v47  ;;  %v1132_v52 = vcombine.high %v1108_v45, %v1123_v47  ;;  %v3005_v7 = vpop.eup %3004 }
 0x496   : > { %v1769_v16 = vmul.f32 %v3005_v7, %v3715_v57  ;;  %v1776_v55 = vpack.c.bf16 %v1768_v14, %v1768_v14  ;;  %v1050_v57 = vcombine.high %v3749_v34, %v3567_v40  ;;  %v1130_v33 = vrot.slane %v1116_v24, %v3550_v28 }
 0x497   : > { %v1167_v54 = vcombine.low %v1073_v48, %v1080_v49  ;;  %v2686_v56 = vcombine.high %v1073_v48, %v1080_v49  ;;  %v1139_v11 = vrot.slane %v1131_v51, %v3569_v42  ;;  %v1146_v12 = vrot.slane %v1132_v52, %v3569_v42 }
 0x498   : > { %v1777_v31 = vpack.c.bf16 %v1769_v16, %v1769_v16  ;;  %v1064_v36 = vrot.slane %v1050_v57, %v3550_v28  ;;  %v1049_v40 = vrot.slane %v1035_v32, %v3550_v28  ;;  %v1147_v30 = vcombine.low %v1115_v35, %v1130_v33 }
 0x499   : > { %v1174_v46 = vrot.slane %v1167_v54, %v3550_v28  ;;  %v1182_v50 = vrot.slane %v2686_v56, %v3550_v28  ;;  %v1192_v58 = vcombine.low %v1139_v11, %v1146_v12  ;;  %v2687_v59 = vcombine.high %v1139_v11, %v1146_v12 }
 0x49a   : > { %v1148_v37 = vcombine.high %v1115_v35, %v1130_v33  ;;  %v1081_v38 = vcombine.low %v1049_v40, %v1064_v36  ;;  %v1082_v41 = vcombine.high %v1049_v40, %v1064_v36  ;;  %v1155_v43 = vrot.slane %v1147_v30, %v3569_v42 }
 0x49b   : > { %v1183_v60 = vcombine.low %v1174_v46, %v1182_v50  ;;  %v1199_v61 = vrot.slane %v1192_v58, %v3550_v28  ;;  %v1207_v62 = vrot.slane %v2687_v59, %v3550_v28 }
 0x49c   : > { %v1162_v44 = vrot.slane %v1148_v37, %v3569_v42  ;;  %v1089_v45 = vrot.slane %v1081_v38, %v3569_v42  ;;  %v1096_v47 = vrot.slane %v1082_v41, %v3569_v42 }
 0x49d   : > { %v1190_v1 = vrot.slane %v1183_v60, %v3569_v42  ;;  %v1208_v3 = vcombine.low %v1199_v61, %v1207_v62 }
 0x49e   : > { %v1242_v48 = vcombine.low %v1155_v43, %v1162_v44  ;;  %v2689_v49 = vcombine.high %v1155_v43, %v1162_v44  ;;  %v1217_v51 = vcombine.low %v1089_v45, %v1096_v47  ;;  %v2688_v52 = vcombine.high %v1089_v45, %v1096_v47 }
 0x49f   : > { %v1191_v6 = vcombine.high %v1190_v1, %v3226_v39  ;;  %v1215_v8 = vrot.slane %v1208_v3, %v3569_v42  ;;  %v1270_v9 = vshrl.u32 %v1190_v1, 16 }
 0x4a0   : > { %v1249_v54 = vrot.slane %v1242_v48, %v3550_v28  ;;  %v1257_v56 = vrot.slane %v2689_v49, %v3550_v28  ;;  %v1224_v11 = vrot.slane %v1217_v51, %v3550_v28  ;;  %v1232_v12 = vrot.slane %v2688_v52, %v3550_v28 }
 0x4a1   : > { %v1269_v13 = vpack.i.b16 %v1215_v8, %v1190_v1  ;;  %v1271_v5 = vshrl.u32 %v1215_v8, 16  ;;  %v1216_v10 = vcombine.high %v1215_v8, %v3226_v39  ;;  %v1276_v4 = vshrl.u32 %v1191_v6, 16 }
 0x4a2   : > { %v1258_v50 = vcombine.low %v1249_v54, %v1257_v56  ;;  %v1233_v59 = vcombine.low %v1224_v11, %v1232_v12 }
 0x4a3   : > { %v1789_v19 = vsel %vm1787_vm3, %v1269_v13, 0  ;;  %v1272_v21 = vpack.i.b16 %v1271_v5, %v1270_v9  ;;  %v1275_v22 = vpack.i.b16 %v1216_v10, %v1191_v6  ;;  %v1277_v23 = vshrl.u32 %v1216_v10, 16 }
 0x4a4   : > { %2821 = vmatpush3.bf16.msra.mxu1 %v1789_v19  ;;  %v1265_v61 = vrot.slane %v1258_v50, %v3569_v42  ;;  %v1240_v1 = vrot.slane %v1233_v59, %v3569_v42 }
 0x4a5   : > { %v1835_v25 = vsel %vm1787_vm3, %v1272_v21, 0  ;;  %2832 = vmatprep.subr.bf16.mxu1 %v3218_v0  ;;  %v1278_v26 = vpack.i.b16 %v1277_v23, %v1276_v4  ;;  %v1881_v29 = vsel %vm1787_vm3, %v1275_v22, 0 }
 0x4a6   : > { %2827 = vmatpush3.bf16.msra.mxu0 %v1835_v25  ;;  %v1283_v2 = vshrl.u32 %v1265_v61, 16  ;;  %v1282_v6 = vshrl.u32 %v1240_v1, 16  ;;  %v1266_v9 = vcombine.high %v1265_v61, %v3226_v39  ;;  %v1281_v4 = vpack.i.b16 %v1265_v61, %v1240_v1 }
 0x4a7   : > { %2823 = vmatmul.mubr.msk.bf16.vlgmr.msra.gmra.mrb[16].mxu1 %vm1291_vm2, %v1776_v55  ;;  %2838 = vmatprep.subr.bf16.mxu0 %v3218_v0  ;;  %v1927_v34 = vsel %vm1787_vm3, %v1278_v26, 0  ;;  %v1241_v19 = vcombine.high %v1240_v1, %v3226_v39 }
 0x4a8   : > { %2833 = vmatpush3.bf16.msra.mxu1 %v1881_v29  ;;  %2834 = vmatprep.mubr.msk.bf16.mxu1 %vm3219_vm0, %v3218_v0  ;;  %v1284_v13 = vpack.i.b16 %v1283_v2, %v1282_v6 }
 0x4a9   : > { %2829 = vmatmul.mubr.msk.bf16.vlgmr.msra.gmra.mrb[20].mxu0 %vm1291_vm2, %v1777_v31  ;;  %2844 = vmatprep.subr.bf16.mxu1 %v3218_v0  ;;  %v1288_v39 = vshrl.u32 %v1241_v19, 16  ;;  %v1287_v57 = vpack.i.b16 %v1266_v9, %v1241_v19 }
 0x4aa   : > { %2839 = vmatpush3.bf16.msra.mxu0 %v1927_v34  ;;  %2840 = vmatprep.mubr.msk.bf16.mxu0 %vm3219_vm0, %v3218_v0  ;;  %v2019_v22 = vsel %vm1787_vm3, %v1284_v13, 0 }
 0x4ab   : > { %2850 = vmatprep.subr.bf16.mxu0 %v3218_v0 }
 0x4bd   : > { %v1747_v46 = vpop.xlane.xlu0 %1746 }
 0x4be   : > { %3006 = vrcp.f32 %v1747_v46 }
 0x4bf   : > { %v1744_v58 = vpop.xlane.xlu1 %1743 }
 0x4c0   : > { %3008 = vrcp.f32 %v1744_v58 }
 0x4c1   : > { %v1750_v60 = vpop.xlane.xlu0 %1749 }
 0x4c2   : > { %3010 = vrcp.f32 %v1750_v60 }
 0x4c3   : > { %v1753_v62 = vpop.xlane.xlu1 %1752 }
 0x4c4   : > { %3012 = vrcp.f32 %v1753_v62 }
 0x4c5   : > { %v1756_v14 = vpop.xlane.xlu0 %1755 }
 0x4c7   : > { %v1759_v3 = vpop.xlane.xlu1 %1758 }
 0x4c8   : > { %v3007_v7 = vpop.eup %3006  ;;  %3014 = vrcp.f32 %v1759_v3 }
 0x4c9   : > { %v1771_v8 = vmul.f32 %v3007_v7, %v3723_v53  ;;  %3016 = vrcp.f32 %v1756_v14  ;;  %v1289_v53 = vshrl.u32 %v1266_v9, 16 }
 0x4ca   : > { %v3009_v5 = vpop.eup %3008 }
 0x4cb   : > { %v1770_v10 = vmul.f32 %v3009_v5, %v3725_v63  ;;  %v1779_v16 = vpack.c.bf16 %v1771_v8, %v1771_v8  ;;  %v1973_v63 = vsel %vm1787_vm3, %v1281_v4, 0  ;;  %v1290_v26 = vpack.i.b16 %v1289_v53, %v1288_v39 }
 0x4cc   : > { %v3011_v21 = vpop.eup %3010 }
 0x4cd   : > { %2841 = vmatmul.mubr.msk.bf16.vlgmr.msra.gmra.mrb[24].mxu0 %vm1291_vm2, %v1779_v16  ;;  %v1778_v23 = vpack.c.bf16 %v1770_v10, %v1770_v10  ;;  %v1772_v55 = vmul.f32 %v3011_v21, %v3729_v15  ;;  %v2065_v15 = vsel %vm1787_vm3, %v1287_v57, 0 }
 0x4ce   : > { %v3013_v24 = vpop.eup %3012  ;;  %2851 = vmatpush3.bf16.msra.mxu0 %v2019_v22  ;;  %2852 = vmatprep.mubr.msk.bf16.mxu0 %vm3219_vm0, %v3218_v0 }
 0x4cf   : > { %v1773_v25 = vmul.f32 %v3013_v24, %v3733_v17  ;;  %2835 = vmatmul.mubr.msk.bf16.vlgmr.msra.gmra.mrb[20].mxu1 %vm1291_vm2, %v1778_v23  ;;  %2862 = vmatprep.subr.bf16.mxu0 %v3218_v0  ;;  %v2111_v17 = vsel %vm1787_vm3, %v1290_v26, 0  ;;  %v1780_v31 = vpack.c.bf16 %v1772_v55, %v1772_v55 }
 0x4d0   : > { %2845 = vmatpush3.bf16.msra.mxu1 %v1973_v63  ;;  %2846 = vmatprep.mubr.msk.bf16.mxu1 %vm3219_vm0, %v3218_v0 }
 0x4d1   : > { %2856 = vmatprep.subr.bf16.mxu1 %v3218_v0  ;;  %v1781_v27 = vpack.c.bf16 %v1773_v25, %v1773_v25 }
 0x4d2   : > { %v3015_v29 = vpop.eup %3014 }
 0x4d3   : > { %v3017_v32 = vpop.eup %3016  ;;  %v1775_v33 = vmul.f32 %v3015_v29, %v3741_v20 }
 0x4d4   : > { %v1774_v34 = vmul.f32 %v3017_v32, %v3737_v18 }
 0x4d5   : > { %2853 = vmatmul.mubr.msk.bf16.vlgmr.msra.gmra.mrb[28].mxu0 %vm1291_vm2, %v1781_v27  ;;  %v1783_v35 = vpack.c.bf16 %v1775_v33, %v1775_v33 }
 0x4d6   : > { %2863 = vmatpush3.bf16.msra.mxu0 %v2111_v17  ;;  %2864 = vmatprep.mubr.msk.bf16.mxu0 %vm3219_vm0, %v3218_v0  ;;  %v1782_v36 = vpack.c.bf16 %v1774_v34, %v1774_v34 }
 0x4d7   : > { %2847 = vmatmul.mubr.msk.bf16.vlgmr.msra.gmra.mrb[24].mxu1 %vm1291_vm2, %v1780_v31 }
 0x4d8   : > { %2857 = vmatpush3.bf16.msra.mxu1 %v2065_v15  ;;  %2858 = vmatprep.mubr.msk.bf16.mxu1 %vm3219_vm0, %v3218_v0 }
 0x4d9   : > { %2868 = vmatprep.subr.bf16.mxu1 %v3218_v0 }
 0x4dd   : > { %2865 = vmatmul.mubr.msk.bf16.vlgmr.msra.gmra.mrb[32].mxu0 %vm1291_vm2, %v1783_v35 }
 0x4df   : > { %2859 = vmatmul.mubr.msk.bf16.vlgmr.msra.gmra.mrb[28].mxu1 %vm1291_vm2, %v1782_v36 }
 0x4e0   : > { %2872 = vmatprep.mubr.msk.bf16.mxu1 %vm3219_vm0, %v3218_v0 }
 0x57a   : > { %v1825_v20 = vpop.f32.mrb[16].mxu1 }
 0x57b   : > { %v2824_v40 = vpop.f32.mrb[17].mxu1 }
 0x57c   : > { %v1828_v30 = vpop.f32.mrb[18].mxu1  ;;  %v1871_v37 = vpop.f32.mrb[20].mxu0 }
 0x57d   : > { %v2825_v38 = vpop.f32.mrb[19].mxu1  ;;  %v2830_v41 = vpop.f32.mrb[21].mxu0 }
 0x57e   : > { %v1874_v43 = vpop.f32.mrb[22].mxu0 }
 0x57f   : > { %v2831_v44 = vpop.f32.mrb[23].mxu0 }
 0x5a0   : > { %v1963_v18 = vpop.f32.mrb[24].mxu0 }
 0x5a1   : > { %v2169_v45 = vcombine.low %v1871_v37, %v1963_v18  ;;  %v2170_v47 = vcombine.high %v1871_v37, %v1963_v18  ;;  %v2842_v48 = vpop.f32.mrb[25].mxu0 }
 0x5a2   : > { %v1917_v49 = vpop.f32.mrb[20].mxu1  ;;  %v1966_v51 = vpop.f32.mrb[26].mxu0 }
 0x5a3   : > { %v2153_v52 = vcombine.low %v1825_v20, %v1917_v49  ;;  %v2154_v54 = vcombine.high %v1825_v20, %v1917_v49  ;;  %v2836_v56 = vpop.f32.mrb[21].mxu1  ;;  %v2843_v11 = vpop.f32.mrb[27].mxu0  ;;  %v2177_v46 = vrot.slane %v2169_v45, %v3550_v28  ;;  %v2184_v50 = vrot.slane %v2170_v47, %v3550_v28 }
 0x5a4   : > { %v1920_v12 = vpop.f32.mrb[22].mxu1 }
 0x5a5   : > { %v2161_v58 = vrot.slane %v2153_v52, %v3550_v28  ;;  %v2168_v59 = vrot.slane %v2154_v54, %v3550_v28  ;;  %v2837_v60 = vpop.f32.mrb[23].mxu1 }
 0x5a7   : > { %v2185_v61 = vcombine.low %v2161_v58, %v2177_v46  ;;  %v2186_v62 = vcombine.high %v2161_v58, %v2177_v46  ;;  %v2201_v1 = vcombine.low %v2168_v59, %v2184_v50  ;;  %v2202_v2 = vcombine.high %v2168_v59, %v2184_v50 }
 0x5a8   : > { %v2055_v3 = vpop.f32.mrb[28].mxu0 }
 0x5a9   : > { %v2193_v6 = vrot.slane %v2185_v61, %v3569_v42  ;;  %v2200_v7 = vrot.slane %v2186_v62, %v3569_v42  ;;  %v2209_v8 = vrot.slane %v2201_v1, %v3569_v42  ;;  %v2216_v14 = vrot.slane %v2202_v2, %v3569_v42  ;;  %v2854_v13 = vpop.f32.mrb[29].mxu0  ;;  %v2984_v2 = vld [vmem:[%s3953_s5] sm:$0xff]  }
 0x5aa   : > { %v2009_v9 = vpop.f32.mrb[24].mxu1  ;;  %v2058_v5 = vpop.f32.mrb[30].mxu0  ;;  %2869 = vmatpush3.bf16.msra.mxu1 %v2984_v2 }
 0x5ab   : > { %v2289_v10 = vcombine.low %v2193_v6, %v2200_v7  ;;  %v2706_v16 = vcombine.high %v2193_v6, %v2200_v7  ;;  %v2305_v4 = vcombine.low %v2209_v8, %v2216_v14  ;;  %v2707_v19 = vcombine.high %v2209_v8, %v2216_v14  ;;  %v2848_v21 = vpop.f32.mrb[25].mxu1  ;;  %v2855_v22 = vpop.f32.mrb[31].mxu0  ;;  %2870 = vmatprep.subr.bf16.mxu1 %v3218_v0 }
 0x5ac   : > { %v2012_v23 = vpop.f32.mrb[26].mxu1  ;;  %v2985_v21 = vld [vmem:[%s3953_s5 + $0x8] sm:$0xff]  }
 0x5ad   : > { %v2296_v53 = vrot.slane %v2289_v10, %v3550_v28  ;;  %v2304_v24 = vrot.slane %v2706_v16, %v3550_v28  ;;  %v2312_v25 = vrot.slane %v2305_v4, %v3550_v28  ;;  %v2320_v63 = vrot.slane %v2707_v19, %v3550_v28  ;;  %v2849_v39 = vpop.f32.mrb[27].mxu1 }
 0x5ae   : > { %2871 = vmatpush3.bf16.msra.mxu1 %v2985_v21 }
 0x5af   : > { %v2322_v55 = vcombine.high %v2296_v53, %v2304_v24  ;;  %v2338_v26 = vcombine.high %v2312_v25, %v2320_v63  ;;  %v2321_v27 = vcombine.low %v2296_v53, %v2304_v24  ;;  %v2337_v57 = vcombine.low %v2312_v25, %v2320_v63 }
 0x5b0   : > { %v2147_v29 = vpop.f32.mrb[32].mxu0 }
 0x5b1   : > { %v2237_v17 = vcombine.low %v2055_v3, %v2147_v29  ;;  %v2238_v31 = vcombine.high %v2055_v3, %v2147_v29  ;;  %v2866_v32 = vpop.f32.mrb[33].mxu0  ;;  %v2336_v33 = vrot.slane %v2322_v55, %v3569_v42  ;;  %v2352_v15 = vrot.slane %v2338_v26, %v3569_v42 }
 0x5b2   : > { %v2101_v34 = vpop.f32.mrb[28].mxu1  ;;  %v2150_v35 = vpop.f32.mrb[34].mxu0  ;;  %v3855_v36 = vrot.slane %v2321_v27, %v3569_v42  ;;  %v3858_v20 = vrot.slane %v2337_v57, %v3569_v42 }
 0x5b3   : > { %v2221_v40 = vcombine.low %v2009_v9, %v2101_v34  ;;  %v2222_v30 = vcombine.high %v2009_v9, %v2101_v34  ;;  %v2860_v37 = vpop.f32.mrb[29].mxu1  ;;  %v2867_v38 = vpop.f32.mrb[35].mxu0  ;;  %v2355_v43 = vcombine.low %v2336_v33, %v2352_v15  ;;  %v2356_v18 = vcombine.high %v2336_v33, %v2352_v15 }
 0x5b4   : > { %v2104_v41 = vpop.f32.mrb[30].mxu1  ;;  %v2354_v44 = vcombine.high %v3855_v36, %v3858_v20  ;;  %v2353_v45 = vcombine.low %v3855_v36, %v3858_v20  ;;  %v2245_v47 = vrot.slane %v2237_v17, %v3550_v28  ;;  %v2252_v48 = vrot.slane %v2238_v31, %v3550_v28  ;;  %v2710_v20 = vld [vmem:[%s3954_s6] ss:$0 sm:$0xff] }
 0x5b5   : > { %v2229_v49 = vrot.slane %v2221_v40, %v3550_v28  ;;  %v2236_v51 = vrot.slane %v2222_v30, %v3550_v28  ;;  %v2861_v52 = vpop.f32.mrb[31].mxu1 }
 0x5b7   : > { %v2253_v54 = vcombine.low %v2229_v49, %v2245_v47  ;;  %v2254_v56 = vcombine.high %v2229_v49, %v2245_v47  ;;  %v2269_v11 = vcombine.low %v2236_v51, %v2252_v48  ;;  %v2270_v12 = vcombine.high %v2236_v51, %v2252_v48 }
 0x5b9   : > { %v2261_v46 = vrot.slane %v2253_v54, %v3569_v42  ;;  %v2268_v50 = vrot.slane %v2254_v56, %v3569_v42  ;;  %v2277_v58 = vrot.slane %v2269_v11, %v3569_v42  ;;  %v2284_v59 = vrot.slane %v2270_v12, %v3569_v42 }
 0x5bb   : > { %v2357_v60 = vcombine.low %v2261_v46, %v2268_v50  ;;  %v2708_v61 = vcombine.high %v2261_v46, %v2268_v50  ;;  %v2373_v62 = vcombine.low %v2277_v58, %v2284_v59  ;;  %v2709_v1 = vcombine.high %v2277_v58, %v2284_v59 }
 0x5bd   : > { %v2364_v3 = vrot.slane %v2357_v60, %v3550_v28  ;;  %v2372_v6 = vrot.slane %v2708_v61, %v3550_v28  ;;  %v2380_v7 = vrot.slane %v2373_v62, %v3550_v28  ;;  %v2388_v8 = vrot.slane %v2709_v1, %v3550_v28 }
 0x5bf   : > { %v2390_v14 = vcombine.high %v2364_v3, %v2372_v6  ;;  %v2406_v13 = vcombine.high %v2380_v7, %v2388_v8  ;;  %v2389_v9 = vcombine.low %v2364_v3, %v2372_v6  ;;  %v2405_v5 = vcombine.low %v2380_v7, %v2388_v8 }
 0x5c1   : > { %v2404_v10 = vrot.slane %v2390_v14, %v3569_v42  ;;  %v2420_v16 = vrot.slane %v2406_v13, %v3569_v42  ;;  %v2397_v4 = vrot.slane %v2389_v9, %v3569_v42  ;;  %v2413_v19 = vrot.slane %v2405_v5, %v3569_v42 }
 0x5c3   : > { %v2423_v28 = vcombine.low %v2404_v10, %v2420_v16  ;;  %v2422_v22 = vcombine.high %v2397_v4, %v2413_v19  ;;  %v2424_v23 = vcombine.high %v2404_v10, %v2420_v16  ;;  %v2421_v53 = vcombine.low %v2397_v4, %v2413_v19 }
 0x5c5   : > { %v2971_v24 = vpack.i.bf16 %v2423_v28, %v2355_v43  ;;  %v2966_v25 = vpack.i.bf16 %v2422_v22, %v2354_v44  ;;  %v2976_v0 = vpack.i.bf16 %v2424_v23, %v2356_v18 }
 0x5c7   : > { %2972 = vrot.lane.b32.xlu1 %v2971_v24, %s3228_s15  ;;  %2967 = vrot.lane.b32.xlu0 %v2966_v25, %s3229_s22 }
 0x5cb   : > { %2977 = vrot.lane.b32.xlu1 %v2976_v0, %s3230_s26 }
 0x639   : > { %v2973_v42 = vpop.permute.xlu1 %2972  ;;  %v2968_v63 = vpop.permute.xlu0 %2967 }
 0x63a   : > { %v2970_v39 = vunpack.i.h.bf16 %v2968_v63  ;;  %v2969_v55 = vunpack.i.l.bf16 %v2968_v63  ;;  %v2975_v26 = vunpack.i.h.bf16 %v2973_v42  ;;  %v2974_v27 = vunpack.i.l.bf16 %v2973_v42 }
 0x63c   : > { %v2449_v57 = vsel %vm1291_vm2, %v2353_v45, %v2969_v55  ;;  %v2450_v29 = vsel %vm1291_vm2, %v2421_v53, %v2970_v39 }
 0x63d   : > { %v2978_v17 = vpop.permute.xlu1 %2977  ;;  %v2452_v33 = vsel %vm2451_vm4, %v2449_v57, %v2974_v27  ;;  %v2453_v15 = vsel %vm2451_vm4, %v2450_v29, %v2975_v26 }
 0x63e   : > { %v2980_v31 = vunpack.i.h.bf16 %v2978_v17  ;;  %v2979_v32 = vunpack.i.l.bf16 %v2978_v17 }
 0x640   : > { %v2455_v34 = vsel %vm2454_vm5, %v2452_v33, %v2979_v32  ;;  %v2456_v35 = vsel %vm2454_vm5, %v2453_v15, %v2980_v31 }
 0x641   : > { %v2457_v36 = vpack.c.bf16 %v2456_v35, %v2455_v34 }
 0x643   : > { %2873 = vmatmul.mubr.msk.bf16.vlgmr.msra.gmra.mrb[32].mxu1 %vm400_vm1, %v2457_v36 }
 0x716   : > { %v2518_v40 = vpop.f32.mrb[32].mxu1 }
 0x717   : > { %v2519_v30 = vadd.f32 %v2710_v20, %v2518_v40  ;;  %v2874_v37 = vpop.f32.mrb[33].mxu1 }
 0x718   : > { %v2521_v38 = vpop.f32.mrb[34].mxu1 }
 0x719   : > { %2525 = vst.msk [vmem:[%s365_s9] sm:$0xff] %vm400_vm1, %v2519_v30  ;;  %v2522_v41 = vadd.f32 %v2710_v20, %v2521_v38  ;;  %v2875_v43 = vpop.f32.mrb[35].mxu1 }
 0x71b   : > { %2526 = vst.msk [vmem:[%s365_s9 + $0x8] sm:$0xff] %vm400_vm1, %v2522_v41 }
 0x71c   : > { %3147 = shalt.err (!%p3144_p7)
}
 0x71d   : > { %s3148_s21 = scalar_lea.hbm %s3902_s29, 256  ;;  %s3152_s15 = scalar_lea.hbm %s3955_s7, 512 }
 0x71e   : > { %p3149_p3 = scmp.ne.s32.totalorder %s3902_s29, %s3148_s21  ;;  %p3153_p0 = scmp.lt.u32.totalorder %s3902_s29, %s3955_s7 }
 0x71f   : > { %p3154_p2 = scmp.lt.u32.totalorder %s3152_s15, %s3148_s21  ;;  %p3156_p8 = scmp.lt.u32.totalorder %s3148_s21, %s3902_s29 }
 0x720   : > { %p3150_p5 = pnand %p3149_p3, %p3989_p12 }
 0x721   : > { %p3155_p11 = por %p3154_p2, %p3153_p0 }
 0x722   : > { %p3151_p9 = pneg %p3150_p5 }
 0x723   : > { %p3157_p1 = por %p3156_p8, %p3155_p11 }
 0x725   : > { %p3158_p13 = pnand %p3157_p1, %p3151_p9 }
 0x727   : > { %3161 = shalt.err (!%p3158_p13)
}
 0x728   : > { %s3232_s19 = smov 128  }
 0x729   : > { %2888 = dma.vmem_to_hbm [thread:$0]  (%p3989_p12), %s3896_s12, 256, %s3902_s29, %s2528_s28, %s3232_s19, %s3232_s19, %s3229_s22  }
 0x72a PF: > { %s2556_s17 = sand.u32 1, %s3196_s24   ;;  %p3990_p6 = scmp.ne.s32.totalorder %s3972_s8, 0 }
 0x72b   : > { %p3991_p10 = scmp.ge.s32.totalorder %s3208_s27, 2  ;;  %s2557_s9 = scalar_lea.sflag [#allocation4], %s2556_s17 }
 0x72d   : > { %p2905_p4 = pnand %p3991_p10, %p3990_p6 }
 0x72f   : > { %3191 = dma.done.wait (!%p2905_p4), %s2557_s9, 256  }
 0x730   : > { %3193 = vsyncadd (!%p2905_p4), %s2557_s9, 4294967040  ;;  %s3992_s27 = sld [smem:[#allocation16_spill]]  ;;  %s3993_s20 = sld [smem:[#allocation15_spill]] }
 0x731   : > { %s3994_s26 = sld [smem:[#allocation17_spill]]  ;;  %s3995_s24 = smov %s3200_s25 }
 0x736   : > { %p24_p7 = scmp.ge.s32.totalorder %s3992_s27, 4   ;;  %s3996_s25 = smov %s3993_s20 }
 0x738   :  { %26 = sbr.rel (!%p24_p7) target bundleno = 12 (0xc), region = 114 }
 0x73f   :  { %2562 = vsyncpa [#allocation3], 1 }
 0x740   :  { %2564 = vsyncpa [#allocation3 + $0x1], 1 }
 0x741   :  { %2565 = vsyncpa [#allocation6], 1 }
 0x742   :  { %2566 = vsyncpa [#allocation9], 1 }
 0x743   :  { %2568 = vsyncpa [#allocation9 + $0x1], 1 }
 0x744   :  { %2569 = vsyncpa [#allocation4], 1 }
 0x745   :  { %2571 = vsyncpa [#allocation4 + $0x1], 1 }

</bundles_post_ra>
